<compile_context>
chip_gen: v7x
topology: tpu7x:2x2x1
jax: 0.10.0
libtpu: 0.0.40
codegen_flags: <defaults>
</compile_context>

<pallas_src>
import math

import jax
import jax.numpy as jnp
from jax.experimental import pallas as pl
from jax.experimental.pallas import tpu as pltpu

F_DIM = 3                              # feature_dim
E_DIM = 1                              # edge_dim
M_DIM = 16                             # message dim
EDGE_IN = 2 * F_DIM + 1 + E_DIM        # [h_i, h_j, d_ij, e_ij]
H_EDGE = 2 * EDGE_IN                   # edge-MLP hidden (16)
H_COOR = 4 * M_DIM                     # coors-MLP hidden (64)
H_NODE = 2 * F_DIM                     # node-MLP hidden (6)

SELU_ALPHA = 1.6732632423543772
SELU_SCALE = 1.0507009873554805

# ---------------- packed parameter slab ([out, in] orientation) ----------------
# First three entries are kept contiguous so ONE node-level matmul covers all
# weights applied to h (w1_hi, wv1, wn1_h).
PARAM_SPECS = (
    ("w1_hi", (H_EDGE, F_DIM)),
    ("wv1",   (M_DIM, F_DIM)),
    ("wn1_h", (H_NODE, F_DIM)),
    ("w1_hj", (H_EDGE, F_DIM)),
    ("w1_d",  (H_EDGE, 1)),
    ("w1_e",  (H_EDGE, E_DIM)),
    ("b1",    (H_EDGE, 1)),
    ("w2",    (M_DIM, H_EDGE)),
    ("b2",    (M_DIM, 1)),
    ("wc1",   (H_COOR, M_DIM)),
    ("bc1",   (H_COOR, 1)),
    ("wc2",   (1, H_COOR)),
    ("bc2",   (1, 1)),
    ("bv1",   (M_DIM, 1)),
    ("wv2",   (1, M_DIM)),
    ("bv2",   (1, 1)),
    ("wn1_m", (H_NODE, M_DIM)),
    ("bn1",   (H_NODE, 1)),
    ("wn2",   (F_DIM, H_NODE)),
    ("bn2",   (F_DIM, 1)),
)
_SHAPES = dict(PARAM_SPECS)
P_LANES = 64                           # max used column is H_COOR = 64


def _round8(n):
    return ((n + 7) // 8) * 8


_OFFSETS = {}
_row = 0
for _name, (_r, _c) in PARAM_SPECS:
    _OFFSETS[_name] = _row             # every sub-block starts 8-sublane aligned
    _row += _round8(_r)
TOTAL_ROWS = _row                      # multiple of 8 by construction

N_STACK_H = H_EDGE + M_DIM + H_NODE    # rows of the fused node-level weight block
assert _OFFSETS["w1_hi"] == 0
assert _OFFSETS["wv1"] == H_EDGE
assert _OFFSETS["wn1_h"] == H_EDGE + M_DIM


def pack_params(params):
    slab = jnp.zeros((TOTAL_ROWS, P_LANES), jnp.float32)
    for name, (r, c) in PARAM_SPECS:
        off = _OFFSETS[name]
        slab = slab.at[off:off + r, 0:c].set(params[name].astype(jnp.float32))
    return slab


# ---------------- activations ----------------
def _silu(x):
    # x * sigmoid(x) with a single transcendental (tanh on the EUP slot).
    return x * (0.5 * jnp.tanh(0.5 * x) + 0.5)


def _selu(x):
    return SELU_SCALE * jnp.where(x > 0.0, x, SELU_ALPHA * (jnp.exp(x) - 1.0))


# ---------------- kernel ----------------
def egnn_kernel(h_ref, x_ref, v_ref, hj_ref, xj_ref, e_ref, msk_ref, p_ref, out_ref):
    f32 = jnp.float32

    def P(name):
        off = _OFFSETS[name]
        r, c = _SHAPES[name]
        return p_ref[off:off + r, 0:c]

    def dot2d(a, b):
        return jnp.dot(a, b, preferred_element_type=f32)

    def pair_linear(w, t):
        # [C_out, C_in] x [N_j, C_in, R] -> [N_j, C_out, R], batched over j on the MXU.
        wb = jnp.broadcast_to(w[None], (t.shape[0],) + w.shape)
        return jnp.einsum("joc,jcr->jor", wb, t, preferred_element_type=f32)

    h = h_ref[...]                                    # [F, R]       lane = b*N + i
    x = x_ref[...]                                    # [3, R]
    v = v_ref[...]                                    # [3, R]
    hj = hj_ref[...]                                  # [N, F, R]    h_j
    xj = xj_ref[...]                                  # [N, 3, R]    x_j
    e = e_ref[...]                                    # [N, E, R]    e_ij
    msk = msk_ref[...]                                # [N, 1, R]    1.0 iff j != i

    # ---- fused node-level matmul: [w1_hi; wv1; wn1_h] @ h (one MXU push) ----
    nh = dot2d(p_ref[0:N_STACK_H, 0:F_DIM], h)        # [38, R]
    a_i = nh[0:H_EDGE]                                # w1_hi @ h    [H_EDGE, R]
    vh = nh[H_EDGE:H_EDGE + M_DIM]                    # wv1   @ h    [M, R]
    nnh = nh[H_EDGE + M_DIM:N_STACK_H]                # wn1_h @ h    [H_NODE, R]

    # ---- pairwise geometry: outer difference via leading-axis broadcast ----
    rel = x[None, :, :] - xj                          # [N, 3, R]    x_i - x_j
    dist = (rel[:, 0:1, :] * rel[:, 0:1, :]
            + rel[:, 1:2, :] * rel[:, 1:2, :]
            + rel[:, 2:3, :] * rel[:, 2:3, :])        # [N, 1, R]

    # ---- edge MLP layer 1 (split-weight form of the concat Linear) ----
    w1hj = P("w1_hj")                                 # [H_EDGE, F]
    zj = w1hj[None, :, 0:1] * hj[:, 0:1, :]
    for k in range(1, F_DIM):
        zj = zj + w1hj[None, :, k:k + 1] * hj[:, k:k + 1, :]
    w1e = P("w1_e")                                   # [H_EDGE, E]
    ze = w1e[None, :, 0:1] * e[:, 0:1, :]
    for k in range(1, E_DIM):
        ze = ze + w1e[None, :, k:k + 1] * e[:, k:k + 1, :]
    z1 = (a_i[None] + zj + ze
          + P("w1_d")[None] * dist
          + P("b1")[None])                            # [N, H_EDGE, R]
    m = _silu(pair_linear(P("w2"), _silu(z1)) + P("b2")[None])        # [N, M, R]

    # ---- per-pair coordinate weights ----
    ch = _silu(pair_linear(P("wc1"), m) + P("bc1")[None])             # [N, HC, R]
    cw = pair_linear(P("wc2"), ch) + P("bc2")[None]                   # [N, 1, R]

    # ---- masked aggregation over neighbors j != i (leading-axis sum) ----
    agg_x = jnp.sum(rel * (cw * msk), axis=0)         # [3, R]
    m_agg = jnp.sum(m * msk, axis=0)                  # [M, R]

    # ---- velocity gate phi_v(h_i), velocity / coordinate update ----
    vg = dot2d(P("wv2"), _silu(vh + P("bv1"))) + P("bv2")             # [1, R]
    v_new = vg * v + agg_x                            # [3, R]
    x_new = x + v_new                                 # [3, R]

    # ---- node MLP (residual) ----
    nz = _silu(nnh + dot2d(P("wn1_m"), m_agg) + P("bn1"))             # [H_NODE, R]
    h_new = h + dot2d(P("wn2"), nz) + P("bn2")                        # [F, R]

    # fused lane-dense output slab: rows = [t | SELU(x') | SELU(v')]
    out_ref[...] = jnp.concatenate([h_new, _selu(x_new), _selu(v_new)], axis=0)


# ---------------- wrapper ----------------
def egnn_layer(feats, coors, vel, edges, params):
    B, N, F = feats.shape
    E = edges.shape[-1]
    assert F == F_DIM and E == E_DIM, "packed-parameter layout built for F_DIM/E_DIM"
    f32 = jnp.float32

    # batch fold: Bt batches per grid step so R = Bt*N is a multiple of 128
    # whenever the grid has more than one step.
    bt = 128 // math.gcd(N, 128)
    if bt >= B:
        bt = B
    Bp = ((B + bt - 1) // bt) * bt
    pad = Bp - B
    if pad:
        feats = jnp.pad(feats, ((0, pad), (0, 0), (0, 0)))
        coors = jnp.pad(coors, ((0, pad), (0, 0), (0, 0)))
        vel = jnp.pad(vel, ((0, pad), (0, 0), (0, 0)))
        edges = jnp.pad(edges, ((0, pad), (0, 0), (0, 0), (0, 0)))
    R = bt * N
    Rtot = Bp * N
    steps = Bp // bt

    # lane-dense node layouts [C, Rtot], lane index r = b*N + i
    h_n = jnp.transpose(feats, (2, 0, 1)).reshape(F, Rtot).astype(f32)
    x_n = jnp.transpose(coors, (2, 0, 1)).reshape(3, Rtot).astype(f32)
    v_n = jnp.transpose(vel, (2, 0, 1)).reshape(3, Rtot).astype(f32)

    # j-major pair layouts [N_j, C, Rtot] (pure XLA layout plumbing so the
    # kernel needs no cross-lane gathers); value at [j, c, b*N+i]
    hj = jnp.broadcast_to(jnp.transpose(feats, (1, 2, 0))[..., None],
                          (N, F, Bp, N)).reshape(N, F, Rtot).astype(f32)
    xj = jnp.broadcast_to(jnp.transpose(coors, (1, 2, 0))[..., None],
                          (N, 3, Bp, N)).reshape(N, 3, Rtot).astype(f32)
    e_p = jnp.transpose(edges, (2, 3, 0, 1)).reshape(N, E, Rtot).astype(f32)

    # batch-invariant self-mask (1.0 iff j != i), resident across all grid steps
    jj = jnp.arange(N)[:, None, None]
    ii = jnp.tile(jnp.arange(N), bt)[None, None, :]
    msk = (jj != ii).astype(f32)                      # [N, 1, R]

    p_slab = pack_params(params)                      # [TOTAL_ROWS, 64]

    out = pl.pallas_call(
        egnn_kernel,
        out_shape=jax.ShapeDtypeStruct((F + 6, Rtot), f32),
        grid_spec=pltpu.PrefetchScalarGridSpec(
            num_scalar_prefetch=0,
            grid=(steps,),
            in_specs=[
                pl.BlockSpec((F, R), lambda s: (0, s)),
                pl.BlockSpec((3, R), lambda s: (0, s)),
                pl.BlockSpec((3, R), lambda s: (0, s)),
                pl.BlockSpec((N, F, R), lambda s: (0, 0, s)),
                pl.BlockSpec((N, 3, R), lambda s: (0, 0, s)),
                pl.BlockSpec((N, E, R), lambda s: (0, 0, s)),
                pl.BlockSpec((N, 1, R), lambda s: (0, 0, 0)),            # resident
                pl.BlockSpec((TOTAL_ROWS, P_LANES), lambda s: (0, 0)),   # resident
            ],
            out_specs=pl.BlockSpec((F + 6, R), lambda s: (0, s)),
        ),
        compiler_params=pltpu.CompilerParams(
            dimension_semantics=("parallel",),
            vmem_limit_bytes=48 * 1024 * 1024,
        ),
    )(h_n, x_n, v_n, hj, xj, e_p, msk, p_slab)

    out = out[:, :B * N]                              # drop padded batches
    t = jnp.transpose(out[0:F].reshape(F, B, N), (1, 2, 0))
    coors_out = jnp.transpose(out[F:F + 3].reshape(3, B, N), (1, 2, 0))
    vel_out = jnp.transpose(out[F + 3:F + 6].reshape(3, B, N), (1, 2, 0))
    return t, coors_out, vel_out


# ---------------- pure-JAX reference (same math) ----------------
def egnn_reference(feats, coors, vel, edges, params):
    f32 = jnp.float32
    h = feats.astype(f32)
    x = coors.astype(f32)
    v = vel.astype(f32)
    e = edges.astype(f32)
    B, N, F = h.shape
    silu = lambda z: z * jax.nn.sigmoid(z)
    selu = lambda z: SELU_SCALE * jnp.where(z > 0.0, z, SELU_ALPHA * (jnp.exp(z) - 1.0))
    p = params

    rel = x[:, :, None, :] - x[:, None, :, :]                      # [B,i,j,3]
    dist = jnp.sum(rel * rel, axis=-1, keepdims=True)              # [B,i,j,1]
    hi = jnp.broadcast_to(h[:, :, None, :], (B, N, N, F))
    hj = jnp.broadcast_to(h[:, None, :, :], (B, N, N, F))
    z1 = (hi @ p["w1_hi"].T + hj @ p["w1_hj"].T + dist @ p["w1_d"].T
          + e @ p["w1_e"].T + p["b1"][:, 0])
    m = silu(silu(z1) @ p["w2"].T + p["b2"][:, 0])                 # [B,i,j,M]
    cw = silu(m @ p["wc1"].T + p["bc1"][:, 0]) @ p["wc2"].T + p["bc2"][:, 0]
    mask = (1.0 - jnp.eye(N))[None, :, :, None]
    agg_x = jnp.sum(rel * cw * mask, axis=2)
    m_agg = jnp.sum(m * mask, axis=2)
    vg = silu(h @ p["wv1"].T + p["bv1"][:, 0]) @ p["wv2"].T + p["bv2"][:, 0]
    v_new = vg * v + agg_x
    x_new = x + v_new
    nz = silu(h @ p["wn1_h"].T + m_agg @ p["wn1_m"].T + p["bn1"][:, 0])
    h_new = h + nz @ p["wn2"].T + p["bn2"][:, 0]
    return h_new, selu(x_new), selu(v_new)


# ---------------- init ----------------
def init_params(key):
    """Deterministic PyTorch-Linear-style init (uniform +-1/sqrt(fan_in))."""
    ks = iter(jax.random.split(key, len(PARAM_SPECS)))

    def lin(shape, fan_in):
        b = 1.0 / math.sqrt(fan_in)
        return jax.random.uniform(next(ks), shape, jnp.float32, -b, b)

    fan = {
        "w1_hi": EDGE_IN, "w1_hj": EDGE_IN, "w1_d": EDGE_IN, "w1_e": EDGE_IN, "b1": EDGE_IN,
        "w2": H_EDGE, "b2": H_EDGE,
        "wc1": M_DIM, "bc1": M_DIM, "wc2": H_COOR, "bc2": H_COOR,
        "wv1": F_DIM, "bv1": F_DIM, "wv2": M_DIM, "bv2": M_DIM,
        "wn1_h": F_DIM + M_DIM, "wn1_m": F_DIM + M_DIM, "bn1": F_DIM + M_DIM,
        "wn2": H_NODE, "bn2": H_NODE,
    }
    return {name: lin(shape, fan[name]) for name, shape in PARAM_SPECS}


if __name__ == "__main__":
    key = jax.random.PRNGKey(0)
    kf, kx, kv, ke, kp = jax.random.split(key, 5)
    B, N = 2, 8

    feats = jax.random.normal(kf, (B, N, F_DIM), jnp.float32)
    coors = jax.random.normal(kx, (B, N, 3), jnp.float32)
    vel = jax.random.normal(kv, (B, N, 3), jnp.float32)
    edges = jax.random.normal(ke, (B, N, N, E_DIM), jnp.float32)
    params = init_params(kp)

    t, coors_out, vel_out = jax.jit(egnn_layer)(feats, coors, vel, edges, params)
    jax.block_until_ready((t, coors_out, vel_out))

    assert t.shape == (B, N, F_DIM)
    assert coors_out.shape == (B, N, 3)
    assert vel_out.shape == (B, N, 3)
    assert bool(jnp.all(jnp.isfinite(t)))
    assert bool(jnp.all(jnp.isfinite(coors_out)))
    assert bool(jnp.all(jnp.isfinite(vel_out)))

    # parity check against a pure-JAX reference of the same math
    t_r, c_r, v_r = egnn_reference(feats, coors, vel, edges, params)
    assert bool(jnp.allclose(t, t_r, rtol=2e-3, atol=2e-3))
    assert bool(jnp.allclose(coors_out, c_r, rtol=2e-3, atol=2e-3))
    assert bool(jnp.allclose(vel_out, v_r, rtol=2e-3, atol=2e-3))

    print("KERNEL_OK")
</pallas_src>

<mosaic_0001>
module attributes {stable_mosaic.version = 11 : i64} {
  func.func @egnn_kernel(%arg0: i32, %arg1: memref<3x16xf32, #tpu.memory_space<vmem>>, %arg2: memref<3x16xf32, #tpu.memory_space<vmem>>, %arg3: memref<3x16xf32, #tpu.memory_space<vmem>>, %arg4: memref<8x3x16xf32, #tpu.memory_space<vmem>>, %arg5: memref<8x3x16xf32, #tpu.memory_space<vmem>>, %arg6: memref<8x1x16xf32, #tpu.memory_space<vmem>>, %arg7: memref<8x1x16xf32, #tpu.memory_space<vmem>>, %arg8: memref<344x64xf32, #tpu.memory_space<vmem>>, %arg9: memref<9x16xf32, #tpu.memory_space<vmem>>) attributes {dimension_semantics = [#tpu.dimension_semantics<parallel>], iteration_bounds = array<i64: 1>, scalar_prefetch = 0 : i64, scratch_operands = 0 : i64, tpu.core_type = #tpu.core_type<tc>, window_params = [{transform_indices = @transform_0, window_bounds = array<i64: 3, 16>}, {transform_indices = @transform_1, window_bounds = array<i64: 3, 16>}, {transform_indices = @transform_2, window_bounds = array<i64: 3, 16>}, {transform_indices = @transform_3, window_bounds = array<i64: 8, 3, 16>}, {transform_indices = @transform_4, window_bounds = array<i64: 8, 3, 16>}, {transform_indices = @transform_5, window_bounds = array<i64: 8, 1, 16>}, {pipeline_mode = #tpu.pipeline_mode<synchronous>, transform_indices = @transform_6, window_bounds = array<i64: 8, 1, 16>}, {pipeline_mode = #tpu.pipeline_mode<synchronous>, transform_indices = @transform_7, window_bounds = array<i64: 344, 64>}, {transform_indices = @transform_8, window_bounds = array<i64: 9, 16>}]} {
    %c0 = arith.constant 0 : index
    %c0_0 = arith.constant 0 : index
    %0 = vector.load %arg1[%c0, %c0_0] : memref<3x16xf32, #tpu.memory_space<vmem>>, vector<3x16xf32>
    %c0_1 = arith.constant 0 : index
    %c0_2 = arith.constant 0 : index
    %1 = vector.load %arg2[%c0_1, %c0_2] : memref<3x16xf32, #tpu.memory_space<vmem>>, vector<3x16xf32>
    %c0_3 = arith.constant 0 : index
    %c0_4 = arith.constant 0 : index
    %2 = vector.load %arg3[%c0_3, %c0_4] : memref<3x16xf32, #tpu.memory_space<vmem>>, vector<3x16xf32>
    %c0_5 = arith.constant 0 : index
    %c0_6 = arith.constant 0 : index
    %c0_7 = arith.constant 0 : index
    %3 = vector.load %arg4[%c0_5, %c0_6, %c0_7] : memref<8x3x16xf32, #tpu.memory_space<vmem>>, vector<8x3x16xf32>
    %c0_8 = arith.constant 0 : index
    %c0_9 = arith.constant 0 : index
    %c0_10 = arith.constant 0 : index
    %4 = vector.load %arg5[%c0_8, %c0_9, %c0_10] : memref<8x3x16xf32, #tpu.memory_space<vmem>>, vector<8x3x16xf32>
    %c0_11 = arith.constant 0 : index
    %c0_12 = arith.constant 0 : index
    %c0_13 = arith.constant 0 : index
    %5 = vector.load %arg6[%c0_11, %c0_12, %c0_13] : memref<8x1x16xf32, #tpu.memory_space<vmem>>, vector<8x1x16xf32>
    %c0_14 = arith.constant 0 : index
    %c0_15 = arith.constant 0 : index
    %c0_16 = arith.constant 0 : index
    %6 = vector.load %arg7[%c0_14, %c0_15, %c0_16] : memref<8x1x16xf32, #tpu.memory_space<vmem>>, vector<8x1x16xf32>
    %c0_17 = arith.constant 0 : index
    %c0_18 = arith.constant 0 : index
    %7 = vector.load %arg8[%c0_17, %c0_18] : memref<344x64xf32, #tpu.memory_space<vmem>>, vector<38x3xf32>
    %cst = arith.constant dense<0.000000e+00> : vector<38x16xf32>
    %8 = tpu.matmul %7, %0, %cst {dimension_numbers = #tpu.dot_dimension_numbers<[1], [0], [0], [1], [0, 0, 1, 1], [], []>} : vector<38x3xf32>, vector<3x16xf32>, vector<38x16xf32> -> vector<38x16xf32>
    %9 = vector.extract_strided_slice %8 {offsets = [0, 0], sizes = [16, 16], strides = [1, 1]} : vector<38x16xf32> to vector<16x16xf32>
    %10 = vector.extract_strided_slice %8 {offsets = [16, 0], sizes = [16, 16], strides = [1, 1]} : vector<38x16xf32> to vector<16x16xf32>
    %11 = vector.extract_strided_slice %8 {offsets = [32, 0], sizes = [6, 16], strides = [1, 1]} : vector<38x16xf32> to vector<6x16xf32>
    %12 = vector.shape_cast %1 : vector<3x16xf32> to vector<1x3x16xf32>
    %13 = vector.broadcast %12 : vector<1x3x16xf32> to vector<8x3x16xf32>
    %14 = arith.subf %13, %4 : vector<8x3x16xf32>
    %15 = vector.extract_strided_slice %14 {offsets = [0, 0, 0], sizes = [8, 1, 16], strides = [1, 1, 1]} : vector<8x3x16xf32> to vector<8x1x16xf32>
    %16 = vector.extract_strided_slice %14 {offsets = [0, 0, 0], sizes = [8, 1, 16], strides = [1, 1, 1]} : vector<8x3x16xf32> to vector<8x1x16xf32>
    %17 = arith.mulf %15, %16 : vector<8x1x16xf32>
    %18 = vector.extract_strided_slice %14 {offsets = [0, 1, 0], sizes = [8, 1, 16], strides = [1, 1, 1]} : vector<8x3x16xf32> to vector<8x1x16xf32>
    %19 = vector.extract_strided_slice %14 {offsets = [0, 1, 0], sizes = [8, 1, 16], strides = [1, 1, 1]} : vector<8x3x16xf32> to vector<8x1x16xf32>
    %20 = arith.mulf %18, %19 : vector<8x1x16xf32>
    %21 = arith.addf %17, %20 : vector<8x1x16xf32>
    %22 = vector.extract_strided_slice %14 {offsets = [0, 2, 0], sizes = [8, 1, 16], strides = [1, 1, 1]} : vector<8x3x16xf32> to vector<8x1x16xf32>
    %23 = vector.extract_strided_slice %14 {offsets = [0, 2, 0], sizes = [8, 1, 16], strides = [1, 1, 1]} : vector<8x3x16xf32> to vector<8x1x16xf32>
    %24 = arith.mulf %22, %23 : vector<8x1x16xf32>
    %25 = arith.addf %21, %24 : vector<8x1x16xf32>
    %c40 = arith.constant 40 : index
    %c0_19 = arith.constant 0 : index
    %26 = vector.load %arg8[%c40, %c0_19] : memref<344x64xf32, #tpu.memory_space<vmem>>, vector<16x3xf32>
    %27 = vector.extract_strided_slice %26 {offsets = [0, 0], sizes = [16, 1], strides = [1, 1]} : vector<16x3xf32> to vector<16x1xf32>
    %28 = vector.shape_cast %27 : vector<16x1xf32> to vector<1x16x1xf32>
    %29 = vector.extract_strided_slice %3 {offsets = [0, 0, 0], sizes = [8, 1, 16], strides = [1, 1, 1]} : vector<8x3x16xf32> to vector<8x1x16xf32>
    %30 = vector.broadcast %28 : vector<1x16x1xf32> to vector<8x16x16xf32>
    %31 = vector.broadcast %29 : vector<8x1x16xf32> to vector<8x16x16xf32>
    %32 = arith.mulf %30, %31 : vector<8x16x16xf32>
    %33 = vector.extract_strided_slice %26 {offsets = [0, 1], sizes = [16, 1], strides = [1, 1]} : vector<16x3xf32> to vector<16x1xf32>
    %34 = vector.shape_cast %33 : vector<16x1xf32> to vector<1x16x1xf32>
    %35 = vector.extract_strided_slice %3 {offsets = [0, 1, 0], sizes = [8, 1, 16], strides = [1, 1, 1]} : vector<8x3x16xf32> to vector<8x1x16xf32>
    %36 = vector.broadcast %34 : vector<1x16x1xf32> to vector<8x16x16xf32>
    %37 = vector.broadcast %35 : vector<8x1x16xf32> to vector<8x16x16xf32>
    %38 = arith.mulf %36, %37 : vector<8x16x16xf32>
    %39 = arith.addf %32, %38 : vector<8x16x16xf32>
    %40 = vector.extract_strided_slice %26 {offsets = [0, 2], sizes = [16, 1], strides = [1, 1]} : vector<16x3xf32> to vector<16x1xf32>
    %41 = vector.shape_cast %40 : vector<16x1xf32> to vector<1x16x1xf32>
    %42 = vector.extract_strided_slice %3 {offsets = [0, 2, 0], sizes = [8, 1, 16], strides = [1, 1, 1]} : vector<8x3x16xf32> to vector<8x1x16xf32>
    %43 = vector.broadcast %41 : vector<1x16x1xf32> to vector<8x16x16xf32>
    %44 = vector.broadcast %42 : vector<8x1x16xf32> to vector<8x16x16xf32>
    %45 = arith.mulf %43, %44 : vector<8x16x16xf32>
    %46 = arith.addf %39, %45 : vector<8x16x16xf32>
    %c72 = arith.constant 72 : index
    %c0_20 = arith.constant 0 : index
    %47 = vector.load %arg8[%c72, %c0_20] : memref<344x64xf32, #tpu.memory_space<vmem>>, vector<16x1xf32>
    %48 = vector.shape_cast %47 : vector<16x1xf32> to vector<1x16x1xf32>
    %49 = vector.broadcast %48 : vector<1x16x1xf32> to vector<8x16x16xf32>
    %50 = vector.broadcast %5 : vector<8x1x16xf32> to vector<8x16x16xf32>
    %51 = arith.mulf %49, %50 : vector<8x16x16xf32>
    %52 = vector.shape_cast %9 : vector<16x16xf32> to vector<1x16x16xf32>
    %53 = vector.broadcast %52 : vector<1x16x16xf32> to vector<8x16x16xf32>
    %54 = arith.addf %53, %46 : vector<8x16x16xf32>
    %55 = arith.addf %54, %51 : vector<8x16x16xf32>
    %c56 = arith.constant 56 : index
    %c0_21 = arith.constant 0 : index
    %56 = vector.load %arg8[%c56, %c0_21] : memref<344x64xf32, #tpu.memory_space<vmem>>, vector<16x1xf32>
    %57 = vector.shape_cast %56 : vector<16x1xf32> to vector<1x16x1xf32>
    %58 = vector.broadcast %57 : vector<1x16x1xf32> to vector<8x16x16xf32>
    %59 = vector.broadcast %25 : vector<8x1x16xf32> to vector<8x16x16xf32>
    %60 = arith.mulf %58, %59 : vector<8x16x16xf32>
    %61 = arith.addf %55, %60 : vector<8x16x16xf32>
    %c88 = arith.constant 88 : index
    %c0_22 = arith.constant 0 : index
    %62 = vector.load %arg8[%c88, %c0_22] : memref<344x64xf32, #tpu.memory_space<vmem>>, vector<16x1xf32>
    %63 = vector.shape_cast %62 : vector<16x1xf32> to vector<1x16x1xf32>
    %64 = vector.broadcast %63 : vector<1x16x1xf32> to vector<8x16x16xf32>
    %65 = arith.addf %61, %64 : vector<8x16x16xf32>
    %c104 = arith.constant 104 : index
    %c0_23 = arith.constant 0 : index
    %66 = vector.load %arg8[%c104, %c0_23] : memref<344x64xf32, #tpu.memory_space<vmem>>, vector<16x16xf32>
    %cst_24 = arith.constant 5.000000e-01 : f32
    %67 = vector.broadcast %cst_24 : f32 to vector<8x16x16xf32>
    %68 = arith.mulf %67, %65 : vector<8x16x16xf32>
    %69 = math.tanh %68 : vector<8x16x16xf32>
    %cst_25 = arith.constant 5.000000e-01 : f32
    %70 = vector.broadcast %cst_25 : f32 to vector<8x16x16xf32>
    %71 = arith.mulf %70, %69 : vector<8x16x16xf32>
    %cst_26 = arith.constant 5.000000e-01 : f32
    %72 = vector.broadcast %cst_26 : f32 to vector<8x16x16xf32>
    %73 = arith.addf %71, %72 : vector<8x16x16xf32>
    %74 = arith.mulf %65, %73 : vector<8x16x16xf32>
    %75 = vector.shape_cast %66 : vector<16x16xf32> to vector<1x16x16xf32>
    %76 = vector.shape_cast %75 : vector<1x16x16xf32> to vector<1x16x16xf32>
    %77 = vector.broadcast %76 : vector<1x16x16xf32> to vector<8x16x16xf32>
    "tpu.trace_start"() <{level = 10 : i32, message = "joc,jcr->jor"}> : () -> ()
    %cst_27 = arith.constant dense<0.000000e+00> : vector<8x16x16xf32>
    %78 = tpu.matmul %77, %74, %cst_27 {dimension_numbers = #tpu.dot_dimension_numbers<[2], [1], [1], [2], [0, 0, 0, 1, 1, 2], [0], [0]>} : vector<8x16x16xf32>, vector<8x16x16xf32>, vector<8x16x16xf32> -> vector<8x16x16xf32>
    "tpu.trace_stop"() : () -> ()
    %c120 = arith.constant 120 : index
    %c0_28 = arith.constant 0 : index
    %79 = vector.load %arg8[%c120, %c0_28] : memref<344x64xf32, #tpu.memory_space<vmem>>, vector<16x1xf32>
    %80 = vector.shape_cast %79 : vector<16x1xf32> to vector<1x16x1xf32>
    %81 = vector.broadcast %80 : vector<1x16x1xf32> to vector<8x16x16xf32>
    %82 = arith.addf %78, %81 : vector<8x16x16xf32>
    %cst_29 = arith.constant 5.000000e-01 : f32
    %83 = vector.broadcast %cst_29 : f32 to vector<8x16x16xf32>
    %84 = arith.mulf %83, %82 : vector<8x16x16xf32>
    %85 = math.tanh %84 : vector<8x16x16xf32>
    %cst_30 = arith.constant 5.000000e-01 : f32
    %86 = vector.broadcast %cst_30 : f32 to vector<8x16x16xf32>
    %87 = arith.mulf %86, %85 : vector<8x16x16xf32>
    %cst_31 = arith.constant 5.000000e-01 : f32
    %88 = vector.broadcast %cst_31 : f32 to vector<8x16x16xf32>
    %89 = arith.addf %87, %88 : vector<8x16x16xf32>
    %90 = arith.mulf %82, %89 : vector<8x16x16xf32>
    %c136 = arith.constant 136 : index
    %c0_32 = arith.constant 0 : index
    %91 = vector.load %arg8[%c136, %c0_32] : memref<344x64xf32, #tpu.memory_space<vmem>>, vector<64x16xf32>
    %92 = vector.shape_cast %91 : vector<64x16xf32> to vector<1x64x16xf32>
    %93 = vector.shape_cast %92 : vector<1x64x16xf32> to vector<1x64x16xf32>
    %94 = vector.broadcast %93 : vector<1x64x16xf32> to vector<8x64x16xf32>
    "tpu.trace_start"() <{level = 10 : i32, message = "joc,jcr->jor"}> : () -> ()
    %cst_33 = arith.constant dense<0.000000e+00> : vector<8x64x16xf32>
    %95 = tpu.matmul %94, %90, %cst_33 {dimension_numbers = #tpu.dot_dimension_numbers<[2], [1], [1], [2], [0, 0, 0, 1, 1, 2], [0], [0]>} : vector<8x64x16xf32>, vector<8x16x16xf32>, vector<8x64x16xf32> -> vector<8x64x16xf32>
    "tpu.trace_stop"() : () -> ()
    %c200 = arith.constant 200 : index
    %c0_34 = arith.constant 0 : index
    %96 = vector.load %arg8[%c200, %c0_34] : memref<344x64xf32, #tpu.memory_space<vmem>>, vector<64x1xf32>
    %97 = vector.shape_cast %96 : vector<64x1xf32> to vector<1x64x1xf32>
    %98 = vector.broadcast %97 : vector<1x64x1xf32> to vector<8x64x16xf32>
    %99 = arith.addf %95, %98 : vector<8x64x16xf32>
    %cst_35 = arith.constant 5.000000e-01 : f32
    %100 = vector.broadcast %cst_35 : f32 to vector<8x64x16xf32>
    %101 = arith.mulf %100, %99 : vector<8x64x16xf32>
    %102 = math.tanh %101 : vector<8x64x16xf32>
    %cst_36 = arith.constant 5.000000e-01 : f32
    %103 = vector.broadcast %cst_36 : f32 to vector<8x64x16xf32>
    %104 = arith.mulf %103, %102 : vector<8x64x16xf32>
    %cst_37 = arith.constant 5.000000e-01 : f32
    %105 = vector.broadcast %cst_37 : f32 to vector<8x64x16xf32>
    %106 = arith.addf %104, %105 : vector<8x64x16xf32>
    %107 = arith.mulf %99, %106 : vector<8x64x16xf32>
    %c264 = arith.constant 264 : index
    %c0_38 = arith.constant 0 : index
    %108 = vector.load %arg8[%c264, %c0_38] : memref<344x64xf32, #tpu.memory_space<vmem>>, vector<1x64xf32>
    %109 = vector.shape_cast %108 : vector<1x64xf32> to vector<1x1x64xf32>
    %110 = vector.shape_cast %109 : vector<1x1x64xf32> to vector<1x1x64xf32>
    %111 = vector.broadcast %110 : vector<1x1x64xf32> to vector<8x1x64xf32>
    "tpu.trace_start"() <{level = 10 : i32, message = "joc,jcr->jor"}> : () -> ()
    %cst_39 = arith.constant dense<0.000000e+00> : vector<8x1x16xf32>
    %112 = tpu.matmul %111, %107, %cst_39 {dimension_numbers = #tpu.dot_dimension_numbers<[2], [1], [1], [2], [0, 0, 0, 1, 1, 2], [0], [0]>} : vector<8x1x64xf32>, vector<8x64x16xf32>, vector<8x1x16xf32> -> vector<8x1x16xf32>
    "tpu.trace_stop"() : () -> ()
    %c272 = arith.constant 272 : index
    %c0_40 = arith.constant 0 : index
    %113 = vector.load %arg8[%c272, %c0_40] : memref<344x64xf32, #tpu.memory_space<vmem>>, vector<1x1xf32>
    %114 = vector.shape_cast %113 : vector<1x1xf32> to vector<1x1x1xf32>
    %115 = vector.broadcast %114 : vector<1x1x1xf32> to vector<8x1x16xf32>
    %116 = arith.addf %112, %115 : vector<8x1x16xf32>
    %117 = arith.mulf %116, %6 : vector<8x1x16xf32>
    %118 = vector.broadcast %117 : vector<8x1x16xf32> to vector<8x3x16xf32>
    %119 = arith.mulf %14, %118 : vector<8x3x16xf32>
    %cst_41 = arith.constant dense<0.000000e+00> : vector<3x16xf32>
    %120 = vector.multi_reduction <add>, %119, %cst_41 [0] : vector<8x3x16xf32> to vector<3x16xf32>
    %121 = vector.broadcast %6 : vector<8x1x16xf32> to vector<8x16x16xf32>
    %122 = arith.mulf %90, %121 : vector<8x16x16xf32>
    %cst_42 = arith.constant dense<0.000000e+00> : vector<16x16xf32>
    %123 = vector.multi_reduction <add>, %122, %cst_42 [0] : vector<8x16x16xf32> to vector<16x16xf32>
    %c296 = arith.constant 296 : index
    %c0_43 = arith.constant 0 : index
    %124 = vector.load %arg8[%c296, %c0_43] : memref<344x64xf32, #tpu.memory_space<vmem>>, vector<1x16xf32>
    %c280 = arith.constant 280 : index
    %c0_44 = arith.constant 0 : index
    %125 = vector.load %arg8[%c280, %c0_44] : memref<344x64xf32, #tpu.memory_space<vmem>>, vector<16x1xf32>
    %126 = vector.broadcast %125 : vector<16x1xf32> to vector<16x16xf32>
    %127 = arith.addf %10, %126 : vector<16x16xf32>
    %cst_45 = arith.constant 5.000000e-01 : f32
    %128 = vector.broadcast %cst_45 : f32 to vector<16x16xf32>
    %129 = arith.mulf %128, %127 : vector<16x16xf32>
    %130 = math.tanh %129 : vector<16x16xf32>
    %cst_46 = arith.constant 5.000000e-01 : f32
    %131 = vector.broadcast %cst_46 : f32 to vector<16x16xf32>
    %132 = arith.mulf %131, %130 : vector<16x16xf32>
    %cst_47 = arith.constant 5.000000e-01 : f32
    %133 = vector.broadcast %cst_47 : f32 to vector<16x16xf32>
    %134 = arith.addf %132, %133 : vector<16x16xf32>
    %135 = arith.mulf %127, %134 : vector<16x16xf32>
    %cst_48 = arith.constant dense<0.000000e+00> : vector<1x16xf32>
    %136 = tpu.matmul %124, %135, %cst_48 {dimension_numbers = #tpu.dot_dimension_numbers<[1], [0], [0], [1], [0, 0, 1, 1], [], []>} : vector<1x16xf32>, vector<16x16xf32>, vector<1x16xf32> -> vector<1x16xf32>
    %c304 = arith.constant 304 : index
    %c0_49 = arith.constant 0 : index
    %137 = vector.load %arg8[%c304, %c0_49] : memref<344x64xf32, #tpu.memory_space<vmem>>, vector<1x1xf32>
    %138 = vector.broadcast %137 : vector<1x1xf32> to vector<1x16xf32>
    %139 = arith.addf %136, %138 : vector<1x16xf32>
    %140 = vector.broadcast %139 : vector<1x16xf32> to vector<3x16xf32>
    %141 = arith.mulf %140, %2 : vector<3x16xf32>
    %142 = arith.addf %141, %120 : vector<3x16xf32>
    %143 = arith.addf %1, %142 : vector<3x16xf32>
    %c312 = arith.constant 312 : index
    %c0_50 = arith.constant 0 : index
    %144 = vector.load %arg8[%c312, %c0_50] : memref<344x64xf32, #tpu.memory_space<vmem>>, vector<6x16xf32>
    %cst_51 = arith.constant dense<0.000000e+00> : vector<6x16xf32>
    %145 = tpu.matmul %144, %123, %cst_51 {dimension_numbers = #tpu.dot_dimension_numbers<[1], [0], [0], [1], [0, 0, 1, 1], [], []>} : vector<6x16xf32>, vector<16x16xf32>, vector<6x16xf32> -> vector<6x16xf32>
    %146 = arith.addf %11, %145 : vector<6x16xf32>
    %c320 = arith.constant 320 : index
    %c0_52 = arith.constant 0 : index
    %147 = vector.load %arg8[%c320, %c0_52] : memref<344x64xf32, #tpu.memory_space<vmem>>, vector<6x1xf32>
    %148 = vector.broadcast %147 : vector<6x1xf32> to vector<6x16xf32>
    %149 = arith.addf %146, %148 : vector<6x16xf32>
    %cst_53 = arith.constant 5.000000e-01 : f32
    %150 = vector.broadcast %cst_53 : f32 to vector<6x16xf32>
    %151 = arith.mulf %150, %149 : vector<6x16xf32>
    %152 = math.tanh %151 : vector<6x16xf32>
    %cst_54 = arith.constant 5.000000e-01 : f32
    %153 = vector.broadcast %cst_54 : f32 to vector<6x16xf32>
    %154 = arith.mulf %153, %152 : vector<6x16xf32>
    %cst_55 = arith.constant 5.000000e-01 : f32
    %155 = vector.broadcast %cst_55 : f32 to vector<6x16xf32>
    %156 = arith.addf %154, %155 : vector<6x16xf32>
    %157 = arith.mulf %149, %156 : vector<6x16xf32>
    %c328 = arith.constant 328 : index
    %c0_56 = arith.constant 0 : index
    %158 = vector.load %arg8[%c328, %c0_56] : memref<344x64xf32, #tpu.memory_space<vmem>>, vector<3x6xf32>
    %cst_57 = arith.constant dense<0.000000e+00> : vector<3x16xf32>
    %159 = tpu.matmul %158, %157, %cst_57 {dimension_numbers = #tpu.dot_dimension_numbers<[1], [0], [0], [1], [0, 0, 1, 1], [], []>} : vector<3x6xf32>, vector<6x16xf32>, vector<3x16xf32> -> vector<3x16xf32>
    %160 = arith.addf %0, %159 : vector<3x16xf32>
    %c336 = arith.constant 336 : index
    %c0_58 = arith.constant 0 : index
    %161 = vector.load %arg8[%c336, %c0_58] : memref<344x64xf32, #tpu.memory_space<vmem>>, vector<3x1xf32>
    %162 = vector.broadcast %161 : vector<3x1xf32> to vector<3x16xf32>
    %163 = arith.addf %160, %162 : vector<3x16xf32>
    %cst_59 = arith.constant 0.000000e+00 : f32
    %164 = vector.broadcast %cst_59 : f32 to vector<3x16xf32>
    %165 = arith.cmpf ogt, %143, %164 : vector<3x16xf32>
    %166 = math.exp %143 : vector<3x16xf32>
    %cst_60 = arith.constant 1.000000e+00 : f32
    %167 = vector.broadcast %cst_60 : f32 to vector<3x16xf32>
    %168 = arith.subf %166, %167 : vector<3x16xf32>
    %cst_61 = arith.constant 1.67326319 : f32
    %169 = vector.broadcast %cst_61 : f32 to vector<3x16xf32>
    %170 = arith.mulf %169, %168 : vector<3x16xf32>
    %171 = arith.select %165, %143, %170 : vector<3x16xi1>, vector<3x16xf32>
    %cst_62 = arith.constant 1.05070102 : f32
    %172 = vector.broadcast %cst_62 : f32 to vector<3x16xf32>
    %173 = arith.mulf %172, %171 : vector<3x16xf32>
    %cst_63 = arith.constant 0.000000e+00 : f32
    %174 = vector.broadcast %cst_63 : f32 to vector<3x16xf32>
    %175 = arith.cmpf ogt, %142, %174 : vector<3x16xf32>
    %176 = math.exp %142 : vector<3x16xf32>
    %cst_64 = arith.constant 1.000000e+00 : f32
    %177 = vector.broadcast %cst_64 : f32 to vector<3x16xf32>
    %178 = arith.subf %176, %177 : vector<3x16xf32>
    %cst_65 = arith.constant 1.67326319 : f32
    %179 = vector.broadcast %cst_65 : f32 to vector<3x16xf32>
    %180 = arith.mulf %179, %178 : vector<3x16xf32>
    %181 = arith.select %175, %142, %180 : vector<3x16xi1>, vector<3x16xf32>
    %cst_66 = arith.constant 1.05070102 : f32
    %182 = vector.broadcast %cst_66 : f32 to vector<3x16xf32>
    %183 = arith.mulf %182, %181 : vector<3x16xf32>
    %184 = tpu.concatenate %163, %173, %183 in 0 : vector<3x16xf32>, vector<3x16xf32>, vector<3x16xf32> -> vector<9x16xf32>
    %c0_67 = arith.constant 0 : index
    %c0_68 = arith.constant 0 : index
    %185 = vector.load %arg9[%c0_67, %c0_68] : memref<9x16xf32, #tpu.memory_space<vmem>>, vector<9x16xf32>
    tpu.vector_store %arg9[%c0_67, %c0_68], %184 {strides = array<i32>} : memref<9x16xf32, #tpu.memory_space<vmem>>, vector<9x16xf32>,
    return
  }
  func.func @transform_0(%arg0: i32) -> (i32, i32) {
    %c0_i32 = arith.constant 0 : i32
    %c0_i32_0 = arith.constant 0 : i32
    return %c0_i32, %arg0 : i32, i32
  }
  func.func @transform_1(%arg0: i32) -> (i32, i32) {
    %c0_i32 = arith.constant 0 : i32
    %c0_i32_0 = arith.constant 0 : i32
    return %c0_i32, %arg0 : i32, i32
  }
  func.func @transform_2(%arg0: i32) -> (i32, i32) {
    %c0_i32 = arith.constant 0 : i32
    %c0_i32_0 = arith.constant 0 : i32
    return %c0_i32, %arg0 : i32, i32
  }
  func.func @transform_3(%arg0: i32) -> (i32, i32, i32) {
    %c0_i32 = arith.constant 0 : i32
    %c0_i32_0 = arith.constant 0 : i32
    %c0_i32_1 = arith.constant 0 : i32
    return %c0_i32, %c0_i32_0, %arg0 : i32, i32, i32
  }
  func.func @transform_4(%arg0: i32) -> (i32, i32, i32) {
    %c0_i32 = arith.constant 0 : i32
    %c0_i32_0 = arith.constant 0 : i32
    %c0_i32_1 = arith.constant 0 : i32
    return %c0_i32, %c0_i32_0, %arg0 : i32, i32, i32
  }
  func.func @transform_5(%arg0: i32) -> (i32, i32, i32) {
    %c0_i32 = arith.constant 0 : i32
    %c0_i32_0 = arith.constant 0 : i32
    %c0_i32_1 = arith.constant 0 : i32
    return %c0_i32, %c0_i32_0, %arg0 : i32, i32, i32
  }
  func.func @transform_6(%arg0: i32) -> (i32, i32, i32) {
    %c0_i32 = arith.constant 0 : i32
    %c0_i32_0 = arith.constant 0 : i32
    %c0_i32_1 = arith.constant 0 : i32
    %c0_i32_2 = arith.constant 0 : i32
    return %c0_i32, %c0_i32_0, %c0_i32_1 : i32, i32, i32
  }
  func.func @transform_7(%arg0: i32) -> (i32, i32) {
    %c0_i32 = arith.constant 0 : i32
    %c0_i32_0 = arith.constant 0 : i32
    %c0_i32_1 = arith.constant 0 : i32
    return %c0_i32, %c0_i32_0 : i32, i32
  }
  func.func @transform_8(%arg0: i32) -> (i32, i32) {
    %c0_i32 = arith.constant 0 : i32
    %c0_i32_0 = arith.constant 0 : i32
    return %c0_i32, %arg0 : i32, i32
  }
}

</mosaic_0001>

<bundles_post_ra>
// kernel: egnn_layer.1
= control target key start
LH: loop header
LB: loop body
LE: loop exit
PB: predicated region body
PF: predicated region fallthrough
CT: control target
= control target key end

     0   :  { %vm85_vm0 = vcmask 1042432   ;;  %vm69_vm1 = vcmask 23552   ;;  %v6627_v0 = vmov 0.0   ;;  %vm4808_vm2 = vmmov 0   ;;  %s6618_s0 = inlined_call_operand.vmem [shape: f32[3,16], index: 0, kind: input, shape index: {}]   ;;  %s6619_s7 = inlined_call_operand.vmem [shape: f32[344,64], index: 7, kind: input, shape index: {}]   ;;  %s6620_s1 = inlined_call_operand.vmem [shape: f32[3,16], index: 1, kind: input, shape index: {}]   ;;  %s6621_s4 = inlined_call_operand.vmem [shape: f32[8,3,16], index: 4, kind: input, shape index: {}]   ;;  %s6622_s3 = inlined_call_operand.vmem [shape: f32[8,3,16], index: 3, kind: input, shape index: {}]   ;;  %s6623_s5 = inlined_call_operand.vmem [shape: f32[8,1,16], index: 5, kind: input, shape index: {}]   ;;  %s6624_s6 = inlined_call_operand.vmem [shape: f32[8,1,16], index: 6, kind: input, shape index: {}]   ;;  %s6625_s2 = inlined_call_operand.vmem [shape: f32[3,16], index: 2, kind: input, shape index: {}]   ;;  %s6626_s8 = inlined_call_operand.vmem [shape: f32[9,16], index: 8, kind: output, shape index: {}]  }
   0x1   :  { %4037 = vmatprep.subr.mxu0 %v6627_v0  ;;  %v29_v1 = vld [vmem:[%s6618_s0] sm:$0x7]  ;;  %4039 = vmatprep.mubr.msk.f32.mxu0 %vm4808_vm2, %v6627_v0  ;;  %v4809_v3 = vmov 1   ;;  %v251_v4 = vld [vmem:[%s6619_s7 + $0x28] sm:$0xff]  ;;  %v252_v6 = vld [vmem:[%s6619_s7 + $0x30] sm:$0xff]  ;;  %v4810_v7 = vmov 0   ;;  %v263_v36 = vlaneseq }
   0x2   :  { %v64_v2 = vld [vmem:[%s6619_s7] sm:$0xff]  ;;  %4038 = vmatpush3.msk.msra.mxu0 %vm85_vm0, %v29_v1  ;;  %4582 = vset.pattern.permute.xlu1 %v4809_v3  ;;  %v65_v5 = vld [vmem:[%s6619_s7 + $0x8] sm:$0xff]  ;;  %v66_v8 = vld [vmem:[%s6619_s7 + $0x10] sm:$0xff]  ;;  %v4811_v9 = vmov 2   ;;  %vm761_vm3 = vcmask 130048   ;;  %vm2695_vm4 = vcmask 523264  }
   0x3   :  { %4040 = vmatmul.mubr.msk.f32.vlgmr.msra.gmra.mrb[0].mxu0 %vm69_vm1, %v64_v2  ;;  %312 = vperm.xlu1 %4582, %v251_v4   ;;  %v67_v10 = vld [vmem:[%s6619_s7 + $0x18] sm:$0xff]  ;;  %v455_v11 = vld [vmem:[%s6619_s7 + $0x48] sm:$0xff]  ;;  %v456_v12 = vld [vmem:[%s6619_s7 + $0x50] sm:$0xff]  ;;  %v4993_v43 = vshrl.u32 %v263_v36, 7  ;;  %vm3307_vm5 = vcmask 124928   ;;  %vm3620_vm6 = vcmask 1045504  }
   0x4   :  { %4042 = vmatprep.mubr.msk.f32.mxu0 %vm4808_vm2, %v6627_v0  ;;  %4581 = vset.pattern.permute.xlu0 %v4810_v7  ;;  %v563_v13 = vld [vmem:[%s6619_s7 + $0x38] sm:$0xff]  ;;  %v564_v15 = vld [vmem:[%s6619_s7 + $0x40] sm:$0xff]  ;;  %v1456_v18 = vld [vmem:[%s6619_s7 + $0xc8] sm:$0xff]  ;;  %vm3616_vm7 = vcmask 48128   ;;  %vm3725_vm9 = vcmask 122880  }
   0x5   :  { %255 = vperm.xlu0 %4581, %v251_v4   ;;  %v639_v14 = vld [vmem:[%s6619_s7 + $0x58] sm:$0xff]  ;;  %v640_v17 = vld [vmem:[%s6619_s7 + $0x60] sm:$0xff]  ;;  %v1457_v21 = vld [vmem:[%s6619_s7 + $0xd0] sm:$0xff]  ;;  %v5022_v55 = vsub.s32 1, %v4993_v43 }
   0x6   :  { %v749_v16 = vld [vmem:[%s6619_s7 + $0x78] sm:$0xff]  ;;  %v750_v19 = vld [vmem:[%s6619_s7 + $0x80] sm:$0xff]  ;;  %v1460_v22 = vld [vmem:[%s6619_s7 + $0xe8] sm:$0xff] }
   0x7   :  { %4043 = vmatmul.mubr.msk.f32.gmra.mrb[2].mxu0 %vm69_vm1, %v65_v5  ;;  %316 = vperm.xlu1 %4582, %v252_v6   ;;  %v1458_v20 = vld [vmem:[%s6619_s7 + $0xd8] sm:$0xff]  ;;  %v1459_v23 = vld [vmem:[%s6619_s7 + $0xe0] sm:$0xff]  ;;  %v1461_v25 = vld [vmem:[%s6619_s7 + $0xf0] sm:$0xff] }
   0x8   :  { %4045 = vmatprep.mubr.msk.f32.mxu0 %vm4808_vm2, %v6627_v0  ;;  %v1462_v24 = vld [vmem:[%s6619_s7 + $0xf8] sm:$0xff]  ;;  %v1463_v27 = vld [vmem:[%s6619_s7 + $0x100] sm:$0xff]  ;;  %v3442_v30 = vld [vmem:[%s6619_s7 + $0x130] sm:$0x1] }
   0x9   :  { %260 = vperm.xlu0 %4581, %v252_v6   ;;  %v3418_v26 = vld [vmem:[%s6619_s7 + $0x118] sm:$0xff]  ;;  %v3603_v28 = vld [vmem:[%s6619_s7 + $0x140] sm:$0x3f]  ;;  %v2689_v31 = vld [vmem:[%s6619_s7 + $0x110] sm:$0x1] }
   0xa   :  { %v3419_v29 = vld [vmem:[%s6619_s7 + $0x120] sm:$0xff]  ;;  %v3695_v32 = vld [vmem:[%s6619_s7 + $0x150] sm:$0x7]  ;;  %v4968_v34 = vld [vmem:[%s6619_s7 + $0x68] sm:$0xff] }
   0xb   :  { %4046 = vmatmul.mubr.msk.f32.gmra.mrb[4].mxu0 %vm69_vm1, %v66_v8  ;;  %4584 = vset.pattern.permute.xlu1 %v4811_v9  ;;  %v68_v33 = vld [vmem:[%s6619_s7 + $0x20] sm:$0x3f]  ;;  %6659 = vst [vmem:[#allocation2_spill] sm:$0xff] %v4968_v34  ;;  %v45_v40 = vld [vmem:[%s6621_s4 + $0x14] sm:$0x7]  ;;  %v5072_v8 = vsub.s32 0, %v4993_v43 }
   0xc   :  { %4048 = vmatprep.mubr.msk.f32.mxu0 %vm4808_vm2, %v6627_v0  ;;  %388 = vperm.xlu1 %4584, %v252_v6   ;;  %v30_v38 = vld [vmem:[%s6620_s1] sm:$0x7]  ;;  %v41_v41 = vld [vmem:[%s6621_s4 + $0x4] sm:$0x7]  ;;  %v47_v42 = vld [vmem:[%s6621_s4 + $0x1c] sm:$0x7] }
   0xd   :  { %4583 = vset.pattern.permute.xlu0 %v4811_v9  ;;  %4058 = vmatprep.mubr.msk.f32.mxu1 %vm761_vm3, %v4968_v34  ;;  %v40_v39 = vld [vmem:[%s6621_s4] sm:$0x7]  ;;  %v42_v45 = vld [vmem:[%s6621_s4 + $0x8] sm:$0x7]  ;;  %v43_v46 = vld [vmem:[%s6621_s4 + $0xc] sm:$0x7]  ;;  %v5005_v48 = vsub.f32 %v30_v38, %v45_v40  ;;  %v5013_v51 = vsub.f32 %v30_v38, %v41_v41  ;;  %v5015_v52 = vsub.f32 %v30_v38, %v47_v42 }
   0xe   :  { %384 = vperm.xlu0 %4583, %v251_v4   ;;  %v5003_v47 = vsub.f32 %v30_v38, %v40_v39  ;;  %v44_v49 = vld [vmem:[%s6621_s4 + $0x10] sm:$0x7]  ;;  %v46_v50 = vld [vmem:[%s6621_s4 + $0x18] sm:$0x7]  ;;  %v5017_v53 = vsub.f32 %v30_v38, %v42_v45  ;;  %v5019_v54 = vsub.f32 %v30_v38, %v43_v46  ;;  %v5033_v59 = vld [vmem:[%s6622_s3 + $0x4] sm:$0x7] }
   0xf   :  { %4049 = vmatmul.mubr.msk.f32.gmra.mrb[6].mxu0 %vm69_vm1, %v67_v10  ;;  %6661 = vst [vmem:[#allocation4_spill] sm:$0xff] %v5005_v48  ;;  %6662 = vst [vmem:[#allocation5_spill] sm:$0xff] %v5013_v51  ;;  %v5026_v57 = vsub.f32 %v30_v38, %v44_v49  ;;  %v5028_v58 = vsub.f32 %v30_v38, %v46_v50  ;;  %v5039_v61 = vmul.f32 %v5005_v48, %v5005_v48  ;;  %v5044_v62 = vld [vmem:[%s6622_s3 + $0x8] sm:$0x7]  ;;  %v5049_v63 = vld [vmem:[%s6622_s3 + $0xc] sm:$0x7] }
  0x10   :  { %4585 = vset.pattern.permute.xlu1 %v4810_v7  ;;  %4051 = vmatprep.mubr.msk.f32.mxu0 %vm4808_vm2, %v6627_v0  ;;  %6660 = vst [vmem:[#allocation3_spill] sm:$0xff] %v5003_v47  ;;  %6663 = vst [vmem:[#allocation6_spill] sm:$0xff] %v5015_v52  ;;  %v187_v60 = vmul.f32 %v5003_v47, %v5003_v47  ;;  %v188_v2 = vmul.f32 %v5013_v51, %v5013_v51  ;;  %v5060_v4 = vld [vmem:[%s6622_s3 + $0x10] sm:$0x7]  ;;  %v5065_v5 = vld [vmem:[%s6622_s3 + $0x14] sm:$0x7] }
  0x11   :  { %459 = vperm.xlu1 %4585, %v455_v11   ;;  %6664 = vst [vmem:[#allocation7_spill] sm:$0xff] %v5017_v53  ;;  %6665 = vst [vmem:[#allocation8_spill] sm:$0xff] %v5019_v54  ;;  %v194_v3 = vmul.f32 %v5015_v52, %v5015_v52  ;;  %v189_v6 = vmul.f32 %v5017_v53, %v5017_v53  ;;  %v5077_v9 = vld [vmem:[%s6622_s3 + $0x18] sm:$0x7]  ;;  %v39_v10 = vld [vmem:[%s6622_s3 + $0x1c] sm:$0x7]  ;;  %v5084_v11 = vrot.slane %v5033_v59, %v5022_v55 }
  0x12   :  { %4586 = vset.pattern.permute.xlu0 %v4810_v7  ;;  %6666 = vst [vmem:[#allocation9_spill] sm:$0xff] %v5026_v57  ;;  %6667 = vst [vmem:[#allocation10_spill] sm:$0xff] %v5028_v58  ;;  %v190_v7 = vmul.f32 %v5019_v54, %v5019_v54  ;;  %v232_v38 = vrot.slane %v5039_v61, 2  ;;  %v228_v40 = vrot.slane %v188_v2, 2  ;;  %v32_v45 = vld [vmem:[%s6622_s3] sm:$0x7] }
  0x13   :  { %464 = vperm.xlu0 %4586, %v456_v12   ;;  %4052 = vmatmul.mubr.msk.f32.gmra.mrb[8].mxu0 %vm69_vm1, %v68_v33  ;;  %6668 = vst [vmem:[#allocation11_spill] sm:$0xff] %v5072_v8  ;;  %v191_v12 = vmul.f32 %v5026_v57, %v5026_v57  ;;  %v227_v33 = vrot.slane %v187_v60, 2  ;;  %v234_v42 = vrot.slane %v194_v3, 2  ;;  %v229_v49 = vrot.slane %v189_v6, 2 }
  0x14   :  { %4093 = vmatprep.mubr.msk.f32.mxu0 %vm761_vm3, %v4968_v34  ;;  %v230_v0 = vrot.slane %v190_v7, 2 }
  0x15   :  { %567 = vperm.xlu1 %4585, %v563_v13   ;;  %v193_v13 = vmul.f32 %v5028_v58, %v5028_v58 }
  0x17   :  { %643 = vperm.xlu0 %4586, %v639_v14   ;;  %v5092_v14 = vrot.slane %v5044_v62, %v5022_v55 }
  0x19   :  { %572 = vperm.xlu1 %4585, %v564_v15   ;;  %v5096_v15 = vrot.slane %v5049_v63, %v5022_v55 }
  0x1b   :  { %753 = vperm.xlu0 %4586, %v749_v16   ;;  %v203_v16 = vrot.slane %v187_v60, 1 }
  0x1d   :  { %648 = vperm.xlu1 %4585, %v640_v17   ;;  %v208_v17 = vrot.slane %v5039_v61, 1 }
  0x1f   :  { %1466 = vperm.xlu0 %4586, %v1456_v18   ;;  %v5101_v18 = vrot.slane %v5060_v4, %v5022_v55  ;;  %v224_v36 = vadd.f32 %v208_v17, %v5039_v61  ;;  %v233_v17 = vrot.slane %v193_v13, 2  ;;  %v5135_v61 = vrot.slane %v5049_v63, %v5072_v8 }
  0x21   :  { %758 = vperm.xlu1 %4585, %v750_v19   ;;  %v5105_v19 = vrot.slane %v5065_v5, %v5022_v55 }
  0x23   :  { %1476 = vperm.xlu0 %4586, %v1458_v20  }
  0x25   :  { %1471 = vperm.xlu1 %4585, %v1457_v21   ;;  %v204_v21 = vrot.slane %v188_v2, 1 }
  0x27   :  { %1486 = vperm.xlu0 %4586, %v1460_v22   ;;  %v210_v22 = vrot.slane %v194_v3, 1  ;;  %v220_v39 = vadd.f32 %v204_v21, %v188_v2  ;;  %v5139_v2 = vrot.slane %v5060_v4, %v5072_v8 }
  0x29   :  { %1481 = vperm.xlu1 %4585, %v1459_v23   ;;  %v5111_v23 = vrot.slane %v5077_v9, %v5022_v55  ;;  %v226_v41 = vadd.f32 %v210_v22, %v194_v3  ;;  %v286_v3 = vrot.slane %v5065_v5, %v5072_v8  ;;  %v266_v22 = vrot.slane %v32_v45, %v5072_v8 }
  0x2b   :  { %1496 = vperm.xlu0 %4586, %v1462_v24   ;;  %v5114_v24 = vrot.slane %v39_v10, %v5022_v55 }
  0x2d   :  { %1491 = vperm.xlu1 %4585, %v1461_v25   ;;  %v205_v25 = vrot.slane %v189_v6, 1 }
  0x2f   :  { %3422 = vperm.xlu0 %4586, %v3418_v26   ;;  %v206_v26 = vrot.slane %v190_v7, 1  ;;  %v221_v46 = vadd.f32 %v205_v25, %v189_v6  ;;  %v393_v6 = vsub.s32 2, %v4993_v43  ;;  %v322_v25 = vrot.slane %v32_v45, %v5022_v55 }
  0x31   :  { %1501 = vperm.xlu1 %4585, %v1463_v27   ;;  %v5118_v27 = vrot.slane %v5033_v59, %v5072_v8  ;;  %v222_v50 = vadd.f32 %v206_v26, %v190_v7  ;;  %v5146_v7 = vrot.slane %v5077_v9, %v5072_v8  ;;  %v248_v26 = vadd.f32 %v232_v38, %v224_v36 }
  0x32   :  { %v245_v48 = vadd.f32 %v229_v49, %v221_v46  ;;  %v5153_v53 = vrot.slane %v32_v45, %v393_v6  ;;  %v5156_v51 = vrot.slane %v5065_v5, %v393_v6  ;;  %v5159_v47 = vrot.slane %v5033_v59, %v393_v6 }
  0x33   :  { %3606 = vperm.xlu0 %4586, %v3603_v28   ;;  %v5122_v28 = vrot.slane %v5044_v62, %v5072_v8  ;;  %v246_v57 = vadd.f32 %v230_v0, %v222_v50  ;;  %v5169_v36 = vrot.slane %v5044_v62, %v393_v6  ;;  %v5172_v0 = vrot.slane %v5049_v63, %v393_v6 }
  0x34   :  { %v5178_v5 = vrot.slane %v248_v26, %v5072_v8  ;;  %v5187_v38 = vrot.slane %v5077_v9, %v393_v6  ;;  %v5192_v63 = vrot.slane %v245_v48, %v5072_v8 }
  0x35   :  { %3427 = vperm.xlu1 %4585, %v3419_v29  }
  0x37   :  { %3445 = vperm.xlu0 %4586, %v3442_v30   ;;  %v207_v30 = vrot.slane %v191_v12, 1 }
  0x39   :  { %2692 = vperm.xlu1 %4585, %v2689_v31   ;;  %v209_v31 = vrot.slane %v193_v13, 1 }
  0x3b   :  { %v225_v58 = vadd.f32 %v209_v31, %v193_v13  ;;  %v250_v31 = vadd.f32 %v234_v42, %v226_v41 }
  0x3d   :  { %3698 = vperm.xlu1 %4585, %v3695_v32   ;;  %v219_v32 = vadd.f32 %v203_v16, %v187_v60  ;;  %v223_v16 = vadd.f32 %v207_v30, %v191_v12  ;;  %v231_v60 = vrot.slane %v191_v12, 2  ;;  %v294_v12 = vrot.slane %v39_v10, %v5072_v8 }
  0x3e   :  { %v244_v30 = vadd.f32 %v228_v40, %v220_v39  ;;  %v249_v43 = vadd.f32 %v233_v17, %v225_v58  ;;  %v5175_v58 = vrot.slane %v5060_v4, %v393_v6  ;;  %v5195_v4 = vrot.slane %v246_v57, %v5072_v8 }
  0x3f   :  { %v243_v21 = vadd.f32 %v227_v33, %v219_v32  ;;  %v247_v54 = vadd.f32 %v231_v60, %v223_v16  ;;  %v5161_v32 = vrot.slane %v39_v10, %v393_v6  ;;  %v5184_v10 = vrot.slane %v250_v31, %v5072_v8 }
  0x40   :  { %v5181_v59 = vrot.slane %v244_v30, %v5072_v8  ;;  %v5201_v40 = vrot.slane %v249_v43, %v5072_v8 }
  0x41   :  { %v5166_v55 = vrot.slane %v243_v21, %v5072_v8  ;;  %v5198_v39 = vrot.slane %v247_v54, %v5072_v8 }
  0x42   :  { %6670 = vst [vmem:[#allocation13_spill] sm:$0xff] %v5201_v40 }
  0x82   :  { %v4974_v35 = vpop.permute.xlu1 %312 }
  0x83   :  { %v353_v41 = vmul.f32 %v5084_v11, %v4974_v35  ;;  %v355_v9 = vmul.f32 %v5092_v14, %v4974_v35  ;;  %v5209_v42 = vmul.f32 %v5096_v15, %v4974_v35  ;;  %v5213_v48 = vmul.f32 %v5101_v18, %v4974_v35 }
  0x84   :  { %v4995_v44 = vpop.permute.xlu0 %255  ;;  %v361_v54 = vmul.f32 %v5105_v19, %v4974_v35  ;;  %v5219_v57 = vmul.f32 %v5111_v23, %v4974_v35  ;;  %v365_v45 = vmul.f32 %v5114_v24, %v4974_v35  ;;  %v351_v46 = vmul.f32 %v322_v25, %v4974_v35 }
  0x85   :  { %v297_v16 = vmul.f32 %v5118_v27, %v4995_v44  ;;  %v299_v60 = vmul.f32 %v5122_v28, %v4995_v44  ;;  %v5243_v26 = vmul.f32 %v5135_v61, %v4995_v44  ;;  %v5247_v30 = vmul.f32 %v5139_v2, %v4995_v44 }
  0x86   :  { %v4976_v37 = vpop.permute.xlu1 %316  ;;  %v305_v31 = vmul.f32 %v286_v3, %v4995_v44  ;;  %v5253_v43 = vmul.f32 %v5146_v7, %v4995_v44 }
  0x87   :  { %v354_v49 = vmul.f32 %v5084_v11, %v4976_v37  ;;  %v362_v50 = vmul.f32 %v5105_v19, %v4976_v37  ;;  %v352_v11 = vmul.f32 %v322_v25, %v4976_v37  ;;  %v366_v19 = vmul.f32 %v5114_v24, %v4976_v37 }
  0x88   :  { %v5051_v1 = vpop.permute.xlu0 %260  ;;  %v309_v25 = vmul.f32 %v294_v12, %v4995_v44  ;;  %v295_v24 = vmul.f32 %v266_v22, %v4995_v44  ;;  %v356_v34 = vmul.f32 %v5092_v14, %v4976_v37 }
  0x89   :  { %v298_v17 = vmul.f32 %v5118_v27, %v5051_v1  ;;  %v306_v6 = vmul.f32 %v286_v3, %v5051_v1  ;;  %v296_v35 = vmul.f32 %v266_v22, %v5051_v1  ;;  %v310_v27 = vmul.f32 %v294_v12, %v5051_v1 }
  0x8a   :  { %v5267_v3 = vmul.f32 %v5101_v18, %v4976_v37 }
  0x8b   :  { %v5024_v56 = vpop.permute.xlu1 %388  ;;  %v368_v12 = vadd.f32 %v352_v11, %v296_v35  ;;  %v378_v44 = vadd.f32 %v362_v50, %v306_v6  ;;  %v370_v22 = vadd.f32 %v354_v49, %v298_v17  ;;  %v382_v40 = vadd.f32 %v366_v19, %v310_v27  ;;  %v3738_v27 = vld [vmem:[%s6623_s5 + $0x1] ss:$0 sm:$0xff] }
  0x8c   :  { %v434_v14 = vmul.f32 %v5156_v51, %v5024_v56  ;;  %v438_v18 = vmul.f32 %v5161_v32, %v5024_v56  ;;  %v304_v50 = vmul.f32 %v5139_v2, %v5051_v1  ;;  %v5289_v49 = vmul.f32 %v5146_v7, %v5051_v1 }
  0x8d   :  { %v5124_v29 = vpop.permute.xlu0 %384  ;;  %v367_v6 = vadd.f32 %v351_v46, %v295_v24  ;;  %v377_v11 = vadd.f32 %v361_v54, %v305_v31  ;;  %v369_v2 = vadd.f32 %v353_v41, %v297_v16  ;;  %v381_v46 = vadd.f32 %v365_v45, %v309_v25  ;;  %v3744_v41 = vld [vmem:[%s6623_s5 + $0x7] ss:$0 sm:$0xff] }
  0x8e   :  { %v423_v35 = vmul.f32 %v5153_v53, %v5124_v29  ;;  %v425_v7 = vmul.f32 %v5159_v47, %v5124_v29  ;;  %v5321_v16 = vadd.f32 %v438_v18, %v382_v40 }
  0x90   :  { %v5107_v20 = vpop.permute.xlu1 %459  ;;  %v5327_v25 = vadd.f32 %v423_v35, %v367_v6 }
  0x92   :  { %v5149_v13 = vpop.permute.xlu0 %464 }
  0x93   :  { %v5359_v18 = vmul.f32 %v3738_v27, %v5149_v13 }
  0x94   :  { %v5131_v52 = vpop.permute.xlu1 %567 }
  0x96   :  { %v5189_v62 = vpop.permute.xlu0 %643 }
  0x97   :  { %6669 = vst [vmem:[#allocation12_spill] sm:$0xff] %v5189_v62  ;;  %v5271_v62 = vmul.f32 %v5111_v23, %v4976_v37  ;;  %v302_v23 = vmul.f32 %v5135_v61, %v5051_v1  ;;  %v3737_v61 = vld [vmem:[%s6623_s5] ss:$0 sm:$0xff] }
  0x98   :  { %v5163_v33 = vpop.permute.xlu1 %572  ;;  %v5330_v24 = vmul.f32 %v3737_v61, %v5107_v20 }
  0x9a   :  { %v5256_v8 = vpop.permute.xlu0 %753 }
  0x9b   :  { %6672 = vst [vmem:[#allocation15_spill] sm:$0xff] %v5256_v8  ;;  %v424_v8 = vmul.f32 %v5153_v53, %v5024_v56  ;;  %v437_v53 = vmul.f32 %v5161_v32, %v5124_v29  ;;  %v428_v32 = vmul.f32 %v5169_v36, %v5024_v56 }
  0x9c   :  { %v5235_v21 = vpop.permute.xlu1 %648 }
  0x9d   :  { %6671 = vst [vmem:[#allocation14_spill] sm:$0xff] %v5235_v21  ;;  %v5263_v21 = vmul.f32 %v5096_v15, %v4976_v37  ;;  %v426_v15 = vmul.f32 %v5159_v47, %v5024_v56  ;;  %v300_v37 = vmul.f32 %v5122_v28, %v5051_v1  ;;  %v433_v28 = vmul.f32 %v5156_v51, %v5124_v29  ;;  %v3742_v1 = vld [vmem:[%s6623_s5 + $0x5] ss:$0 sm:$0xff] }
  0x9e   :  { %v5297_v19 = vpop.permute.xlu0 %1466  ;;  %v5309_v54 = vadd.f32 %v424_v8, %v368_v12  ;;  %v5311_v51 = vadd.f32 %v434_v14, %v378_v44  ;;  %v371_v47 = vadd.f32 %v355_v9, %v299_v60  ;;  %v427_v8 = vmul.f32 %v5169_v36, %v5124_v29 }
  0x9f   :  { %6673 = vst [vmem:[#allocation16_spill] sm:$0xff] %v5297_v19  ;;  %v5316_v31 = vadd.f32 %v426_v15, %v370_v22  ;;  %v372_v45 = vadd.f32 %v356_v34, %v300_v37  ;;  %v5332_v12 = vadd.f32 %v433_v28, %v377_v11  ;;  %v5335_v44 = vmul.f32 %v3742_v1, %v5107_v20  ;;  %v3739_v22 = vld [vmem:[%s6623_s5 + $0x2] ss:$0 sm:$0xff]  ;;  %v3740_v28 = vld [vmem:[%s6623_s5 + $0x3] ss:$0 sm:$0xff] }
  0xa0   :  { %v5291_v17 = vpop.permute.xlu1 %758  ;;  %v5339_v9 = vadd.f32 %v425_v7, %v369_v2  ;;  %v5342_v34 = vmul.f32 %v3738_v27, %v5107_v20  ;;  %v5344_v60 = vadd.f32 %v437_v53, %v381_v46  ;;  %v5347_v36 = vmul.f32 %v3744_v41, %v5107_v20 }
  0xa1   :  { %v5353_v14 = vmul.f32 %v3737_v61, %v5149_v13  ;;  %v5356_v15 = vmul.f32 %v3742_v1, %v5149_v13  ;;  %v5362_v37 = vmul.f32 %v3744_v41, %v5149_v13  ;;  %v443_v35 = vadd.f32 %v427_v8, %v371_v47 }
  0xa2   :  { %v5364_v6 = vpop.permute.xlu0 %1476  ;;  %v5366_v11 = vadd.f32 %v428_v32, %v372_v45  ;;  %v373_v61 = vadd.f32 %v5209_v42, %v5243_v26  ;;  %v429_v1 = vmul.f32 %v5172_v0, %v5124_v29  ;;  %v5377_v2 = vmul.f32 %v5166_v55, %v5131_v52 }
  0xa3   :  { %6675 = vst [vmem:[#allocation18_spill] sm:$0xff] %v5364_v6  ;;  %v5381_v7 = vmul.f32 %v5178_v5, %v5131_v52  ;;  %v519_v46 = vmul.f32 %v3739_v22, %v5107_v20  ;;  %v5385_v53 = vmul.f32 %v3739_v22, %v5149_v13  ;;  %v5389_v27 = vmul.f32 %v5181_v59, %v5131_v52 }
  0xa4   :  { %v5337_v40 = vpop.permute.xlu1 %1471  ;;  %v5393_v42 = vmul.f32 %v5184_v10, %v5131_v52  ;;  %v5397_v26 = vmul.f32 %v5192_v63, %v5131_v52  ;;  %v374_v41 = vadd.f32 %v5263_v21, %v302_v23  ;;  %v430_v47 = vmul.f32 %v5172_v0, %v5024_v56 }
  0xa5   :  { %6674 = vst [vmem:[#allocation17_spill] sm:$0xff] %v5337_v40  ;;  %v521_v45 = vmul.f32 %v3740_v28, %v5107_v20  ;;  %v5404_v8 = vmul.f32 %v3740_v28, %v5149_v13  ;;  %v5408_v32 = vmul.f32 %v5195_v4, %v5131_v52  ;;  %v445_v6 = vadd.f32 %v429_v1, %v373_v61 }
  0xa6   :  { %v375_v19 = vadd.f32 %v5213_v48, %v5247_v30  ;;  %v376_v21 = vadd.f32 %v5267_v3, %v304_v50  ;;  %v431_v0 = vmul.f32 %v5175_v58, %v5124_v29  ;;  %v5419_v23 = vmul.f32 %v5166_v55, %v5163_v33  ;;  %v3741_v48 = vld [vmem:[%s6623_s5 + $0x4] ss:$0 sm:$0xff]  ;;  %v5434_v3 = vpop.permute.xlu0 %1486  ;;  %v3743_v55 = vld [vmem:[%s6623_s5 + $0x6] ss:$0 sm:$0xff] }
  0xa7   :  { %v5423_v28 = vmul.f32 %v5178_v5, %v5163_v33  ;;  %v432_v30 = vmul.f32 %v5175_v58, %v5024_v56  ;;  %6677 = vst [vmem:[#allocation20_spill] sm:$0xff] %v5434_v3  ;;  %v379_v5 = vadd.f32 %v5219_v57, %v5253_v43  ;;  %v435_v50 = vmul.f32 %v5187_v38, %v5124_v29 }
  0xa8   :  { %v5410_v22 = vpop.permute.xlu1 %1481  ;;  %v436_v61 = vmul.f32 %v5187_v38, %v5024_v56  ;;  %v5449_v58 = vmul.f32 %v5184_v10, %v5163_v33  ;;  %v5453_v1 = vmul.f32 %v5192_v63, %v5163_v33  ;;  %v5455_v3 = vadd.f32 %v430_v47, %v374_v41 }
  0xa9   :  { %6676 = vst [vmem:[#allocation19_spill] sm:$0xff] %v5410_v22  ;;  %v5427_v22 = vmul.f32 %v5181_v59, %v5163_v33  ;;  %v380_v59 = vadd.f32 %v5271_v62, %v5289_v49  ;;  %v5459_v57 = vmul.f32 %v5195_v4, %v5163_v33  ;;  %v447_v62 = vadd.f32 %v431_v0, %v375_v19  ;;  %v6679_v0 = vld [vmem:[#allocation13_spill] sm:$0xff] }
  0xaa   :  { %v523_v29 = vmul.f32 %v3741_v48, %v5107_v20  ;;  %v5463_v43 = vmul.f32 %v3741_v48, %v5149_v13  ;;  %v5467_v56 = vmul.f32 %v5198_v39, %v5131_v52  ;;  %v5469_v10 = vadd.f32 %v432_v30, %v376_v21 }
  0xab   :  { %v5473_v38 = vmul.f32 %v5198_v39, %v5163_v33  ;;  %v527_v63 = vmul.f32 %v3743_v55, %v5107_v20  ;;  %v5477_v4 = vmul.f32 %v3743_v55, %v5149_v13  ;;  %v451_v41 = vadd.f32 %v435_v50, %v379_v5  ;;  %v5495_v5 = vpop.permute.xlu0 %1496 }
  0xac   :  { %v5479_v49 = vpop.permute.xlu1 %1491  ;;  %v5481_v47 = vadd.f32 %v436_v61, %v380_v59  ;;  %v5485_v48 = vmul.f32 %v6679_v0, %v5131_v52  ;;  %v5489_v21 = vmul.f32 %v6679_v0, %v5163_v33  ;;  %6680 = vst [vmem:[#allocation13_spill] sm:$0xff] %v5495_v5 }
  0xad   :  { %6678 = vst [vmem:[#allocation21_spill] sm:$0xff] %v5479_v49 }
  0xd6   :  { %v155_v19 = vpop.f32.mrb[0].mxu0 }
  0xd7   :  { %v4041_v39 = vpop.f32.mrb[1].mxu0  ;;  %v531_v20 = vadd.f32 %v5327_v25, %v155_v19  ;;  %v541_v13 = vadd.f32 %v5332_v12, %v155_v19  ;;  %v533_v30 = vadd.f32 %v5339_v9, %v155_v19  ;;  %v545_v55 = vadd.f32 %v5344_v60, %v155_v19 }
  0xd8   :  { %v535_v59 = vadd.f32 %v443_v35, %v155_v19  ;;  %v537_v50 = vadd.f32 %v445_v6, %v155_v19  ;;  %v539_v61 = vadd.f32 %v447_v62, %v155_v19  ;;  %v543_v52 = vadd.f32 %v451_v41, %v155_v19 }
  0xd9   :  { %v547_v49 = vadd.f32 %v531_v20, %v5330_v24  ;;  %v557_v33 = vadd.f32 %v541_v13, %v5335_v44  ;;  %v549_v0 = vadd.f32 %v533_v30, %v5342_v34  ;;  %v561_v25 = vadd.f32 %v545_v55, %v5347_v36  ;;  %v5511_v34 = vpop.permute.xlu1 %1501 }
  0xda   :  { %v5501_v39 = vpop.f32.mrb[2].mxu0  ;;  %v551_v12 = vadd.f32 %v535_v59, %v519_v46  ;;  %v553_v9 = vadd.f32 %v537_v50, %v521_v45  ;;  %v555_v40 = vadd.f32 %v539_v61, %v523_v29  ;;  %v5503_v60 = vadd.f32 %v543_v52, %v527_v63  ;;  %v3423_v63 = vpop.permute.xlu0 %3422 }
  0xdb   :  { %v4044_v5 = vpop.f32.mrb[3].mxu0  ;;  %v532_v6 = vadd.f32 %v5309_v54, %v5501_v39  ;;  %v623_v35 = vadd.f32 %v5377_v2, %v547_v49  ;;  %v542_v24 = vadd.f32 %v5311_v51, %v5501_v39  ;;  %v633_v44 = vadd.f32 %v5381_v7, %v557_v33  ;;  %v6681_v2 = vld [vmem:[#allocation12_spill] sm:$0xff] }
  0xdc   :  { %v534_v36 = vadd.f32 %v5316_v31, %v5501_v39  ;;  %v625_v46 = vadd.f32 %v5389_v27, %v549_v0  ;;  %v546_v45 = vadd.f32 %v5321_v16, %v5501_v39  ;;  %v637_v62 = vadd.f32 %v5393_v42, %v561_v25  ;;  %v6682_v5 = vld [vmem:[#allocation14_spill] sm:$0xff] }
  0xdd   :  { %v548_v54 = vadd.f32 %v532_v6, %v5353_v14  ;;  %v5521_v29 = vadd.f32 %v6681_v2, %v623_v35  ;;  %v558_v51 = vadd.f32 %v542_v24, %v5356_v15  ;;  %v5525_v7 = vadd.f32 %v6681_v2, %v633_v44  ;;  %v3428_v50 = vpop.permute.xlu1 %3427 }
  0xde   :  { %v165_v49 = vpop.f32.mrb[4].mxu0  ;;  %v550_v31 = vadd.f32 %v534_v36, %v5359_v18  ;;  %v5529_v27 = vadd.f32 %v6681_v2, %v625_v46  ;;  %v562_v16 = vadd.f32 %v546_v45, %v5362_v37  ;;  %v5533_v42 = vadd.f32 %v6681_v2, %v637_v62 }
  0xdf   :  { %v5535_v14 = vadd.f32 %v3423_v63, %v165_v49  ;;  %v4047_v19 = vpop.f32.mrb[5].mxu0  ;;  %v624_v15 = vadd.f32 %v5419_v23, %v548_v54  ;;  %v669_v41 = vmul.f32 0.5, %v5521_v29  ;;  %v634_v20 = vadd.f32 %v5423_v28, %v558_v51 }
  0xe0   :  { %v679_v13 = vmul.f32 0.5, %v5525_v7  ;;  %v626_v18 = vadd.f32 %v5427_v22, %v550_v31  ;;  %v671_v30 = vmul.f32 0.5, %v5529_v27  ;;  %v638_v37 = vadd.f32 %v5449_v58, %v562_v16 }
  0xe1   :  { %v3432_v55 = vmul.f32 0.5, %v5535_v14  ;;  %v5546_v59 = vadd.f32 %v6682_v5, %v624_v15  ;;  %4587 = vtanh.f32 %v669_v41  ;;  %v5549_v23 = vadd.f32 %v6682_v5, %v634_v20 }
  0xe2   :  { %v170_v61 = vpop.f32.mrb[6].mxu0  ;;  %4589 = vtanh.f32 %v679_v13  ;;  %v5552_v28 = vadd.f32 %v6682_v5, %v626_v18  ;;  %v5555_v22 = vadd.f32 %v6682_v5, %v638_v37  ;;  %v683_v58 = vmul.f32 0.5, %v5533_v42 }
  0xe3   :  { %4591 = vtanh.f32 %v3432_v55  ;;  %v5558_v52 = vadd.f32 %v3428_v50, %v170_v61  ;;  %v670_v33 = vmul.f32 0.5, %v5546_v59  ;;  %v680_v0 = vmul.f32 0.5, %v5549_v23  ;;  %v4050_v25 = vpop.f32.mrb[7].mxu0 }
  0xe4   :  { %v672_v6 = vmul.f32 0.5, %v5552_v28  ;;  %4593 = vtanh.f32 %v671_v30  ;;  %v684_v35 = vmul.f32 0.5, %v5555_v22  ;;  %v536_v24 = vadd.f32 %v5366_v11, %v5501_v39 }
  0xe5   :  { %v3433_v44 = vmul.f32 0.5, %v5558_v52  ;;  %4595 = vtanh.f32 %v670_v33  ;;  %v627_v36 = vadd.f32 %v5397_v26, %v551_v12  ;;  %v538_v46 = vadd.f32 %v5455_v3, %v5501_v39 }
  0xe6   :  { %4597 = vtanh.f32 %v680_v0  ;;  %v552_v45 = vadd.f32 %v536_v24, %v5385_v53  ;;  %v629_v62 = vadd.f32 %v5408_v32, %v553_v9  ;;  %v540_v54 = vadd.f32 %v5469_v10, %v5501_v39 }
  0xe7   :  { %4599 = vtanh.f32 %v3433_v44  ;;  %v5575_v51 = vadd.f32 %v6681_v2, %v627_v36  ;;  %v554_v11 = vadd.f32 %v538_v46, %v5404_v8  ;;  %v631_v63 = vadd.f32 %v5467_v56, %v555_v40 }
  0xe8   :  { %4601 = vtanh.f32 %v672_v6  ;;  %v628_v26 = vadd.f32 %v5453_v1, %v552_v45  ;;  %v5581_v3 = vadd.f32 %v6681_v2, %v629_v62  ;;  %v556_v53 = vadd.f32 %v540_v54, %v5463_v43 }
  0xe9   :  { %4603 = vtanh.f32 %v683_v58  ;;  %v673_v32 = vmul.f32 0.5, %v5575_v51  ;;  %v630_v10 = vadd.f32 %v5459_v57, %v554_v11  ;;  %v5587_v12 = vadd.f32 %v6681_v2, %v631_v63 }
  0xea   :  { %4605 = vtanh.f32 %v684_v35  ;;  %v5590_v8 = vadd.f32 %v6682_v5, %v628_v26  ;;  %v675_v40 = vmul.f32 0.5, %v5581_v3  ;;  %v632_v1 = vadd.f32 %v5473_v38, %v556_v53 }
  0xeb   :  { %v4588_v56 = vpop.eup %4587  ;;  %4607 = vtanh.f32 %v673_v32  ;;  %v5595_v43 = vadd.f32 %v6682_v5, %v630_v10  ;;  %v677_v9 = vmul.f32 0.5, %v5587_v12  ;;  %v544_v57 = vadd.f32 %v5481_v47, %v5501_v39 }
  0xec   :  { %v4590_v49 = vpop.eup %4589  ;;  %v701_v31 = vmul.f32 0.5, %v4588_v56  ;;  %v674_v16 = vmul.f32 0.5, %v5590_v8  ;;  %4609 = vtanh.f32 %v675_v40  ;;  %v5602_v19 = vadd.f32 %v6682_v5, %v632_v1 }
  0xed   :  { %v4592_v15 = vpop.eup %4591  ;;  %v711_v38 = vmul.f32 0.5, %v4590_v49  ;;  %v676_v41 = vmul.f32 0.5, %v5595_v43  ;;  %4611 = vtanh.f32 %v677_v9  ;;  %v560_v20 = vadd.f32 %v544_v57, %v5477_v4 }
  0xee   :  { %v4594_v13 = vpop.eup %4593  ;;  %v3436_v18 = vmul.f32 0.5, %v4592_v15  ;;  %v717_v30 = vadd.f32 0.5, %v701_v31  ;;  %4613 = vtanh.f32 %v674_v16  ;;  %v678_v47 = vmul.f32 0.5, %v5602_v19 }
  0xef   :  { %v4596_v39 = vpop.eup %4595  ;;  %v727_v37 = vadd.f32 0.5, %v711_v38  ;;  %v703_v55 = vmul.f32 0.5, %v4594_v13  ;;  %4615 = vtanh.f32 %v676_v41  ;;  %v635_v50 = vadd.f32 %v5485_v48, %v5503_v60 }
  0xf0   :  { %v4598_v61 = vpop.eup %4597  ;;  %v3438_v58 = vadd.f32 0.5, %v3436_v18  ;;  %v702_v33 = vmul.f32 0.5, %v4596_v39  ;;  %4617 = vtanh.f32 %v678_v47  ;;  %v733_v4 = vmul.f32 %v717_v30, %v5521_v29 }
  0xf1   :  { %v4600_v0 = vpop.eup %4599  ;;  %v712_v25 = vmul.f32 0.5, %v4598_v61  ;;  %v719_v6 = vadd.f32 0.5, %v703_v55  ;;  %v636_v35 = vadd.f32 %v5489_v21, %v560_v20  ;;  %v743_v46 = vmul.f32 %v727_v37, %v5525_v7 }
  0xf2   :  { %v4602_v24 = vpop.eup %4601  ;;  %v3437_v44 = vmul.f32 0.5, %v4600_v0  ;;  %v718_v36 = vadd.f32 0.5, %v702_v33  ;;  %v5613_v45 = vadd.f32 %v6681_v2, %v635_v50  ;;  %v5616_v60 = vmul.f32 %v3438_v58, %v5535_v14 }
  0xf3   :  { %v4604_v48 = vpop.eup %4603  ;;  %v728_v62 = vadd.f32 0.5, %v712_v25  ;;  %v704_v54 = vmul.f32 0.5, %v4602_v24  ;;  %v735_v29 = vmul.f32 %v719_v6, %v5529_v27  ;;  %v5621_v53 = vadd.f32 %v6682_v5, %v636_v35  ;;  %v6685_v35 = vld [vmem:[#allocation2_spill] sm:$0xff] }
  0xf4   :  { %6683 = vst [vmem:[#allocation12_spill] sm:$0xff] %v5616_v60  ;;  %v4606_v11 = vpop.eup %4605  ;;  %v3439_v63 = vadd.f32 0.5, %v3437_v44  ;;  %v734_v21 = vmul.f32 %v718_v36, %v5546_v59  ;;  %v715_v26 = vmul.f32 0.5, %v4604_v48  ;;  %v681_v14 = vmul.f32 0.5, %v5613_v45 }
  0xf5   :  { %v4608_v7 = vpop.eup %4607  ;;  %v744_v2 = vmul.f32 %v728_v62, %v5549_v23  ;;  %v720_v32 = vadd.f32 0.5, %v704_v54  ;;  %v716_v10 = vmul.f32 0.5, %v4606_v11 }
  0xf6   :  { %v4610_v40 = vpop.eup %4609  ;;  %v5626_v1 = vmul.f32 %v3439_v63, %v5558_v52  ;;  %v4409_v27 = vpack.c.bf16 %v734_v21, %v733_v4  ;;  %v731_v56 = vadd.f32 0.5, %v715_v26  ;;  %v705_v9 = vmul.f32 0.5, %v4608_v7  ;;  %v5670_v63 = vld [vmem:[%s6619_s7 + $0x88] sm:$0xff] }
  0xf7   :  { %v4612_v57 = vpop.eup %4611  ;;  %v4429_v59 = vpack.c.bf16 %v744_v2, %v743_v46  ;;  %v736_v49 = vmul.f32 %v720_v32, %v5552_v28  ;;  %v732_v5 = vadd.f32 0.5, %v716_v10  ;;  %v707_v31 = vmul.f32 0.5, %v4610_v40  ;;  %v668_v28 = vld [vmem:[%s6619_s7 + $0x70] sm:$0xff]  ;;  %v6687_v2 = vld [vmem:[#allocation15_spill] sm:$0xff] }
  0xf8   :  { %6684 = vst [vmem:[#allocation14_spill] sm:$0xff] %v5626_v1  ;;  %v4614_v16 = vpop.eup %4613  ;;  %4410 = vmatprep.subr.bf16.mxu1 %v4409_v27  ;;  %v747_v15 = vmul.f32 %v731_v56, %v5533_v42  ;;  %v709_v38 = vmul.f32 0.5, %v4612_v57  ;;  %v682_v52 = vmul.f32 0.5, %v5621_v53  ;;  %v721_v30 = vadd.f32 0.5, %v705_v9 }
  0xf9   :  { %v4616_v41 = vpop.eup %4615  ;;  %4430 = vmatprep.subr.bf16.mxu0 %v4429_v59  ;;  %4412 = vmatpush3.bf16.msra.mxu1 %v4409_v27  ;;  %v4413_v20 = vpack.c.bf16 %v736_v49, %v735_v29  ;;  %v748_v13 = vmul.f32 %v732_v5, %v5555_v22  ;;  %v706_v18 = vmul.f32 0.5, %v4614_v16  ;;  %v723_v37 = vadd.f32 0.5, %v707_v31  ;;  %v5665_v29 = vpop.f32.mrb[8].mxu0 }
  0xfa   :  { %v4618_v47 = vpop.eup %4617  ;;  %4432 = vmatpush3.bf16.msra.mxu0 %v4429_v59  ;;  %v708_v39 = vmul.f32 0.5, %v4616_v41  ;;  %4619 = vtanh.f32 %v681_v14  ;;  %v725_v61 = vadd.f32 0.5, %v709_v38  ;;  %v737_v22 = vmul.f32 %v721_v30, %v5575_v51  ;;  %6686 = vst [vmem:[#allocation2_spill] sm:$0xff] %v5665_v29  ;;  %v4053_v11 = vpop.f32.mrb[9].mxu0 }
  0xfb   :  { %4414 = vmatprep.subr.bf16.mxu1 %v4413_v20  ;;  %v4437_v42 = vpack.c.bf16 %v748_v13, %v747_v15  ;;  %v722_v55 = vadd.f32 0.5, %v706_v18  ;;  %v710_v50 = vmul.f32 0.5, %v4618_v47  ;;  %4621 = vtanh.f32 %v682_v52 }
  0xfc   :  { %4059 = vmatmul.mubr.msk.f32.vlgmr.msra.gmra.mrb[0].mxu1 %vm761_vm3, %v668_v28  ;;  %v724_v58 = vadd.f32 0.5, %v708_v39  ;;  %v739_v4 = vmul.f32 %v723_v37, %v5581_v3  ;;  %v741_v24 = vmul.f32 %v725_v61, %v5587_v12 }
  0xfd   :  { %4438 = vmatprep.subr.bf16.mxu0 %v4437_v42  ;;  %4094 = vmatmul.mubr.msk.f32.vlgmr.msra.gmra.mrb[10].mxu0 %vm761_vm3, %v668_v28  ;;  %v738_v33 = vmul.f32 %v722_v55, %v5590_v8  ;;  %v726_v0 = vadd.f32 0.5, %v710_v50 }
  0xfe   :  { %4416 = vmatpush3.bf16.msra.mxu1 %v4413_v20  ;;  %4440 = vmatpush3.bf16.msra.mxu0 %v4437_v42  ;;  %v740_v25 = vmul.f32 %v724_v58, %v5595_v43 }
  0xff   :  { %v4417_v6 = vpack.c.bf16 %v738_v33, %v737_v22  ;;  %4065 = vmatprep.mubr.msk.f32.mxu1 %vm761_vm3, %v6685_v35  ;;  %4107 = vmatprep.mubr.msk.f32.mxu0 %vm761_vm3, %v6685_v35  ;;  %v742_v51 = vmul.f32 %v726_v0, %v5602_v19  ;;  %v4799_v33 = vld [vmem:[%s6624_s6] ss:$0 sm:$0xff] }
 0x100   :  { %v4421_v44 = vpack.c.bf16 %v740_v25, %v739_v4 }
 0x101   :  { %4418 = vmatprep.subr.bf16.mxu1 %v4417_v6  ;;  %4066 = vmatmul.mubr.msk.f32.vlgmr.msra.gmra.mrb[2].mxu1 %vm761_vm3, %v668_v28  ;;  %v4425_v8 = vpack.c.bf16 %v742_v51, %v741_v24 }
 0x102   :  { %4108 = vmatmul.mubr.msk.f32.vlgmr.msra.gmra.mrb[12].mxu0 %vm761_vm3, %v668_v28  ;;  %4420 = vmatpush3.bf16.msra.mxu1 %v4417_v6 }
 0x103   :  { %4422 = vmatprep.subr.bf16.mxu1 %v4421_v44  ;;  %4072 = vmatprep.mubr.msk.f32.mxu1 %vm761_vm3, %v6685_v35 }
 0x104   :  { %v4620_v3 = vpop.eup %4619  ;;  %4130 = vmatprep.mubr.msk.f32.mxu0 %vm761_vm3, %v5670_v63 }
 0x105   :  { %4073 = vmatmul.mubr.msk.f32.vlgmr.msra.gmra.mrb[4].mxu1 %vm761_vm3, %v668_v28  ;;  %v713_v43 = vmul.f32 0.5, %v4620_v3  ;;  %v4622_v36 = vpop.eup %4621 }
 0x106   :  { %4424 = vmatpush3.bf16.msra.mxu1 %v4421_v44  ;;  %4079 = vmatprep.mubr.msk.f32.mxu1 %vm761_vm3, %v6685_v35  ;;  %v714_v12 = vmul.f32 0.5, %v4622_v36 }
 0x107   :  { %4426 = vmatprep.subr.bf16.mxu1 %v4425_v8  ;;  %v729_v19 = vadd.f32 0.5, %v713_v43 }
 0x108   :  { %v730_v46 = vadd.f32 0.5, %v714_v12 }
 0x109   :  { %4080 = vmatmul.mubr.msk.f32.vlgmr.msra.gmra.mrb[6].mxu1 %vm761_vm3, %v668_v28  ;;  %v745_v48 = vmul.f32 %v729_v19, %v5613_v45 }
 0x10a   :  { %4428 = vmatpush3.bf16.msra.mxu1 %v4425_v8  ;;  %4086 = vmatprep.mubr.msk.f32.mxu1 %vm761_vm3, %v6685_v35  ;;  %v746_v62 = vmul.f32 %v730_v46, %v5621_v53  ;;  %v5730_v8 = vld [vmem:[%s6624_s6 + $0x5] ss:$0 sm:$0xff] }
 0x10c   :  { %v4433_v54 = vpack.c.bf16 %v746_v62, %v745_v48  ;;  %v4801_v62 = vld [vmem:[%s6624_s6 + $0x1] ss:$0 sm:$0xff] }
 0x10d   :  { %4087 = vmatmul.mubr.msk.f32.vlgmr.msra.gmra.mrb[8].mxu1 %vm761_vm3, %v668_v28 }
 0x10e   :  { %4100 = vmatprep.mubr.msk.f32.mxu1 %vm761_vm3, %v6685_v35  ;;  %4434 = vmatprep.subr.bf16.mxu1 %v4433_v54 }
 0x10f   :  { %4436 = vmatpush3.bf16.msra.mxu1 %v4433_v54 }
 0x112   :  { %4101 = vmatmul.mubr.msk.f32.vlgmr.msra.gmra.mrb[10].mxu1 %vm761_vm3, %v668_v28 }
 0x113   :  { %4114 = vmatprep.mubr.msk.f32.mxu1 %vm761_vm3, %v5670_v63 }
 0x1cf   :  { %v4060_v45 = vpop.f32.mrb[0].mxu1 }
 0x1d0   :  { %v5677_v21 = vadd.f32 %v4060_v45, %v5291_v17  ;;  %v4095_v26 = vpop.f32.mrb[10].mxu0  ;;  %v834_v53 = vpop.f32.mrb[1].mxu1 }
 0x1d1   :  { %v5680_v7 = vadd.f32 %v4095_v26, %v5291_v17  ;;  %v5683_v32 = vadd.f32 %v834_v53, %v6687_v2  ;;  %v1209_v10 = vpop.f32.mrb[11].mxu0  ;;  %v4802_v53 = vld [vmem:[%s6624_s6 + $0x2] ss:$0 sm:$0xff] }
 0x1d2   :  { %v1369_v14 = vmul.f32 0.5, %v5677_v21  ;;  %v5687_v40 = vadd.f32 %v1209_v10, %v6687_v2 }
 0x1d3   :  { %v1379_v27 = vmul.f32 0.5, %v5680_v7  ;;  %v1368_v56 = vmul.f32 0.5, %v5683_v32 }
 0x1d4   :  { %4623 = vtanh.f32 %v1369_v14  ;;  %v1378_v9 = vmul.f32 0.5, %v5687_v40  ;;  %v4067_v57 = vpop.f32.mrb[2].mxu1 }
 0x1d5   :  { %4625 = vtanh.f32 %v1379_v27  ;;  %v5693_v59 = vadd.f32 %v4067_v57, %v5291_v17  ;;  %v4109_v49 = vpop.f32.mrb[12].mxu0  ;;  %v909_v5 = vpop.f32.mrb[3].mxu1 }
 0x1d6   :  { %4627 = vtanh.f32 %v1368_v56  ;;  %v5696_v31 = vadd.f32 %v4109_v49, %v5291_v17  ;;  %v5699_v16 = vadd.f32 %v909_v5, %v6687_v2  ;;  %v1359_v15 = vpop.f32.mrb[13].mxu0  ;;  %v5752_v56 = vld [vmem:[%s6624_s6 + $0x3] ss:$0 sm:$0xff] }
 0x1d7   :  { %4629 = vtanh.f32 %v1378_v9  ;;  %v1371_v38 = vmul.f32 0.5, %v5693_v59  ;;  %v5703_v52 = vadd.f32 %v1359_v15, %v6687_v2  ;;  %v5757_v9 = vld [vmem:[%s6624_s6 + $0x4] ss:$0 sm:$0xff] }
 0x1d8   :  { %v1383_v41 = vmul.f32 0.5, %v5696_v31  ;;  %v1370_v20 = vmul.f32 0.5, %v5699_v16  ;;  %v4074_v13 = vpop.f32.mrb[4].mxu1 }
 0x1d9   :  { %4631 = vtanh.f32 %v1371_v38  ;;  %v1382_v28 = vmul.f32 0.5, %v5703_v52  ;;  %v5709_v18 = vadd.f32 %v4074_v13, %v5291_v17  ;;  %v984_v30 = vpop.f32.mrb[5].mxu1 }
 0x1da   :  { %4633 = vtanh.f32 %v1383_v41  ;;  %v5712_v47 = vadd.f32 %v984_v30, %v6687_v2 }
 0x1db   :  { %4635 = vtanh.f32 %v1370_v20  ;;  %v1373_v39 = vmul.f32 0.5, %v5709_v18 }
 0x1dc   :  { %4637 = vtanh.f32 %v1382_v28  ;;  %v1372_v37 = vmul.f32 0.5, %v5712_v47  ;;  %v4081_v42 = vpop.f32.mrb[6].mxu1 }
 0x1dd   :  { %4639 = vtanh.f32 %v1373_v39  ;;  %v5717_v55 = vadd.f32 %v4081_v42, %v5291_v17  ;;  %v1059_v50 = vpop.f32.mrb[7].mxu1 }
 0x1de   :  { %v4624_v61 = vpop.eup %4623  ;;  %4641 = vtanh.f32 %v1372_v37  ;;  %v5720_v58 = vadd.f32 %v1059_v50, %v6687_v2 }
 0x1df   :  { %v4626_v22 = vpop.eup %4625  ;;  %v1401_v0 = vmul.f32 0.5, %v4624_v61  ;;  %v1375_v4 = vmul.f32 0.5, %v5717_v55 }
 0x1e0   :  { %v4628_v25 = vpop.eup %4627  ;;  %v1411_v6 = vmul.f32 0.5, %v4626_v22  ;;  %v1374_v35 = vmul.f32 0.5, %v5720_v58  ;;  %v4088_v24 = vpop.f32.mrb[8].mxu1 }
 0x1e1   :  { %v4630_v51 = vpop.eup %4629  ;;  %v1417_v44 = vadd.f32 0.5, %v1401_v0  ;;  %v1400_v3 = vmul.f32 0.5, %v4628_v25  ;;  %4643 = vtanh.f32 %v1375_v4  ;;  %v5733_v43 = vadd.f32 %v4088_v24, %v5291_v17  ;;  %v1134_v36 = vpop.f32.mrb[9].mxu1 }
 0x1e2   :  { %v1410_v12 = vmul.f32 0.5, %v4630_v51  ;;  %4645 = vtanh.f32 %v1374_v35  ;;  %v5743_v11 = vadd.f32 %v1134_v36, %v6687_v2  ;;  %v1427_v14 = vadd.f32 0.5, %v1411_v6 }
 0x1e3   :  { %v4632_v19 = vpop.eup %4631  ;;  %v5736_v46 = vmul.f32 %v1417_v44, %v5677_v21  ;;  %v1416_v48 = vadd.f32 0.5, %v1400_v3  ;;  %v1377_v54 = vmul.f32 0.5, %v5733_v43 }
 0x1e4   :  { %v4634_v45 = vpop.eup %4633  ;;  %v1403_v26 = vmul.f32 0.5, %v4632_v19  ;;  %v1426_v49 = vadd.f32 0.5, %v1410_v12  ;;  %v1376_v13 = vmul.f32 0.5, %v5743_v11  ;;  %v5763_v42 = vmul.f32 %v1427_v14, %v5680_v7 }
 0x1e5   :  { %v4636_v10 = vpop.eup %4635  ;;  %v1432_v21 = vmul.f32 %v1416_v48, %v5683_v32  ;;  %v1415_v27 = vmul.f32 0.5, %v4634_v45  ;;  %4647 = vtanh.f32 %v1377_v54  ;;  %v4102_v38 = vpop.f32.mrb[10].mxu1  ;;  %v3372_v32 = vmul.f32 %v4799_v33, %v5736_v46 }
 0x1e6   :  { %v4638_v57 = vpop.eup %4637  ;;  %v1419_v5 = vadd.f32 0.5, %v1403_v26  ;;  %v1402_v15 = vmul.f32 0.5, %v4636_v10  ;;  %v1284_v28 = vpop.f32.mrb[11].mxu1  ;;  %v5766_v0 = vmul.f32 %v1426_v49, %v5687_v40  ;;  %4649 = vtanh.f32 %v1376_v13 }
 0x1e7   :  { %v4640_v41 = vpop.eup %4639  ;;  %v1414_v20 = vmul.f32 0.5, %v4638_v57  ;;  %v3371_v50 = vmul.f32 %v4799_v33, %v1432_v21  ;;  %v1431_v61 = vadd.f32 0.5, %v1415_v27  ;;  %v3402_v24 = vsel %vm761_vm3, %v3372_v32, 0.0 }
 0x1e8   :  { %v4642_v30 = vpop.eup %4641  ;;  %v1435_v39 = vmul.f32 %v1419_v5, %v5693_v59  ;;  %v1418_v37 = vadd.f32 0.5, %v1402_v15  ;;  %v1405_v22 = vmul.f32 0.5, %v4640_v41  ;;  %v5782_v57 = vadd.f32 %v4102_v38, %v5291_v17 }
 0x1e9   :  { %v1404_v6 = vmul.f32 0.5, %v4642_v30  ;;  %v1430_v51 = vadd.f32 0.5, %v1414_v20  ;;  %v3387_v12 = vsel %vm761_vm3, %v3371_v50, 0.0  ;;  %v5773_v19 = vmul.f32 %v1431_v61, %v5696_v31  ;;  %v5806_v61 = vld [vmem:[%s6619_s7 + $0x98] sm:$0xff] }
 0x1ea   :  { %v3374_v4 = vmul.f32 %v4801_v62, %v1435_v39  ;;  %v1434_v25 = vmul.f32 %v1418_v37, %v5699_v16  ;;  %v1421_v44 = vadd.f32 0.5, %v1405_v22  ;;  %v5788_v41 = vadd.f32 %v1284_v28, %v6687_v2 }
 0x1eb   :  { %v4644_v35 = vpop.eup %4643  ;;  %v1420_v33 = vadd.f32 0.5, %v1404_v6  ;;  %v4441_v32 = vpack.c.bf16 %v5736_v46, %v1432_v21  ;;  %v5800_v46 = vld [vmem:[%s6619_s7 + $0x90] sm:$0xff] }
 0x1ec   :  { %v4646_v59 = vpop.eup %4645  ;;  %v3403_v7 = vsel %vm761_vm3, %v3374_v4, 0.0  ;;  %v3373_v3 = vmul.f32 %v4801_v62, %v1434_v25  ;;  %v1407_v36 = vmul.f32 0.5, %v4644_v35  ;;  %v1437_v16 = vmul.f32 %v1421_v44, %v5709_v18 }
 0x1ed   :  { %v3404_v40 = vadd.f32 %v3403_v7, %v3402_v24  ;;  %v1436_v54 = vmul.f32 %v1420_v33, %v5712_v47  ;;  %v1406_v26 = vmul.f32 0.5, %v4646_v59  ;;  %v5779_v62 = vmul.f32 %v1430_v51, %v5703_v52  ;;  %4442 = vmatprep.subr.bf16.mxu1 %v4441_v32  ;;  %v5827_v51 = vld [vmem:[%s6619_s7 + $0xa0] sm:$0xff] }
 0x1ee   :  { %v3388_v48 = vsel %vm761_vm3, %v3373_v3, 0.0  ;;  %v1423_v45 = vadd.f32 0.5, %v1407_v36  ;;  %v3376_v27 = vmul.f32 %v4802_v53, %v1437_v16  ;;  %v1381_v47 = vmul.f32 0.5, %v5782_v57  ;;  %4444 = vmatpush3.bf16.msra.mxu1 %v4441_v32  ;;  %v4805_v36 = vld [vmem:[%s6624_s6 + $0x7] ss:$0 sm:$0xff] }
 0x1ef   :  { %v4648_v10 = vpop.eup %4647  ;;  %v3389_v14 = vadd.f32 %v3388_v48, %v3387_v12  ;;  %v3375_v49 = vmul.f32 %v4802_v53, %v1436_v54  ;;  %v1422_v5 = vadd.f32 0.5, %v1406_v26  ;;  %v1380_v13 = vmul.f32 0.5, %v5788_v41 }
 0x1f0   :  { %v1439_v31 = vmul.f32 %v1423_v45, %v5717_v55  ;;  %v1409_v18 = vmul.f32 0.5, %v4648_v10  ;;  %v3405_v15 = vsel %vm761_vm3, %v3376_v27, 0.0  ;;  %4651 = vtanh.f32 %v1381_v47  ;;  %v4650_v37 = vpop.eup %4649 }
 0x1f1   :  { %v3406_v52 = vadd.f32 %v3405_v15, %v3404_v40  ;;  %v3390_v20 = vsel %vm761_vm3, %v3375_v49, 0.0  ;;  %v1438_v53 = vmul.f32 %v1422_v5, %v5720_v58  ;;  %v4445_v21 = vpack.c.bf16 %v1435_v39, %v1434_v25  ;;  %4115 = vmatmul.mubr.msk.f32.vlgmr.msra.gmra.mrb[12].mxu1 %vm761_vm3, %v5800_v46  ;;  %v5878_v49 = vld [vmem:[%s6619_s7 + $0xc0] sm:$0xff] }
 0x1f2   :  { %v3378_v17 = vmul.f32 %v5752_v56, %v1439_v31  ;;  %v3391_v38 = vadd.f32 %v3390_v20, %v3389_v14  ;;  %v1425_v55 = vadd.f32 0.5, %v1409_v18  ;;  %v4449_v28 = vpack.c.bf16 %v1437_v16, %v1436_v54  ;;  %4117 = vmatprep.mubr.msk.f32.mxu1 %vm761_vm3, %v5806_v61  ;;  %v4806_v16 = vld [vmem:[%s6624_s6 + $0x6] ss:$0 sm:$0xff] }
 0x1f3   :  { %v3377_v2 = vmul.f32 %v5752_v56, %v1438_v53  ;;  %4653 = vtanh.f32 %v1380_v13  ;;  %v4453_v22 = vpack.c.bf16 %v1439_v31, %v1438_v53  ;;  %v1408_v4 = vmul.f32 0.5, %v4650_v37  ;;  %4446 = vmatprep.subr.bf16.mxu0 %v4445_v21 }
 0x1f4   :  { %v3407_v30 = vsel %vm761_vm3, %v3378_v17, 0.0  ;;  %v1441_v50 = vmul.f32 %v1425_v55, %v5733_v43  ;;  %4450 = vmatprep.subr.bf16.mxu1 %v4449_v28  ;;  %v5811_v39 = vpack.c.bf16 %v5763_v42, %v5766_v0  ;;  %v5815_v25 = vpack.c.bf16 %v5773_v19, %v5779_v62  ;;  %4448 = vmatpush3.bf16.msra.mxu0 %v4445_v21  ;;  %v6691_v21 = vld [vmem:[#allocation17_spill] sm:$0xff] }
 0x1f5   :  { %v3408_v58 = vadd.f32 %v3407_v30, %v3406_v52  ;;  %v3392_v56 = vsel %vm761_vm3, %v3377_v2, 0.0  ;;  %v3382_v43 = vmul.f32 %v5730_v8, %v5763_v42  ;;  %v1424_v24 = vadd.f32 0.5, %v1408_v4  ;;  %4452 = vmatpush3.bf16.msra.mxu1 %v4449_v28  ;;  %v5833_v42 = vld [vmem:[%s6619_s7 + $0xa8] sm:$0xff]  ;;  %4454 = vmatprep.subr.bf16.mxu0 %v4453_v22 }
 0x1f6   :  { %v3393_v6 = vadd.f32 %v3392_v56, %v3391_v38  ;;  %v3380_v35 = vmul.f32 %v5757_v9, %v1441_v50  ;;  %v3381_v33 = vmul.f32 %v5730_v8, %v5766_v0  ;;  %4118 = vmatmul.mubr.msk.f32.gmra.mrb[14].mxu1 %vm761_vm3, %v5827_v51  ;;  %v5854_v8 = vld [vmem:[%s6619_s7 + $0xb0] sm:$0xff]  ;;  %v3386_v15 = vmul.f32 %v4805_v36, %v5773_v19 }
 0x1f7   :  { %v1440_v7 = vmul.f32 %v1424_v24, %v5743_v11  ;;  %4131 = vmatmul.mubr.msk.f32.vlgmr.msra.gmra.mrb[14].mxu0 %vm761_vm3, %v5800_v46  ;;  %v3411_v3 = vsel %vm761_vm3, %v3382_v43, 0.0  ;;  %4120 = vmatprep.mubr.msk.f32.mxu1 %vm761_vm3, %v5833_v42  ;;  %v6652_v2 = vmov 0.0|0.0   ;;  %v6693_v43 = vld [vmem:[#allocation19_spill] sm:$0xff] }
 0x1f8   :  { %v3409_v44 = vsel %vm761_vm3, %v3380_v35, 0.0  ;;  %4133 = vmatprep.mubr.msk.f32.mxu0 %vm761_vm3, %v5806_v61  ;;  %4456 = vmatpush3.bf16.msra.mxu0 %v4453_v22  ;;  %v3396_v10 = vsel %vm761_vm3, %v3381_v33, 0.0  ;;  %v3415_v19 = vsel %vm761_vm3, %v3386_v15, 0.0 }
 0x1f9   :  { %v3410_v59 = vadd.f32 %v3409_v44, %v3408_v58  ;;  %v3379_v11 = vmul.f32 %v5757_v9, %v1440_v7  ;;  %v4457_v0 = vpack.c.bf16 %v1441_v50, %v1440_v7  ;;  %4462 = vmatprep.subr.bf16.mxu0 %v5811_v39  ;;  %v5863_v9 = vld [vmem:[%s6619_s7 + $0xb8] sm:$0xff]  ;;  %v6692_v58 = vld [vmem:[#allocation16_spill] sm:$0xff]  ;;  %v6694_v44 = vld [vmem:[#allocation18_spill] sm:$0xff] }
 0x1fa   :  { %v4652_v40 = vpop.eup %4651  ;;  %4121 = vmatmul.mubr.msk.f32.gmra.mrb[16].mxu1 %vm761_vm3, %v5854_v8 }
 0x1fb   :  { %v3412_v12 = vadd.f32 %v3411_v3, %v3410_v59  ;;  %v3394_v48 = vsel %vm761_vm3, %v3379_v11, 0.0  ;;  %v1413_v54 = vmul.f32 0.5, %v4652_v40  ;;  %4134 = vmatmul.mubr.msk.f32.gmra.mrb[16].mxu0 %vm761_vm3, %v5827_v51  ;;  %4458 = vmatprep.subr.bf16.mxu1 %v4457_v0 }
 0x1fc   :  { %v3395_v26 = vadd.f32 %v3394_v48, %v3393_v6  ;;  %4136 = vmatprep.mubr.msk.f32.mxu0 %vm761_vm3, %v5833_v42  ;;  %4123 = vmatprep.mubr.msk.f32.mxu1 %vm761_vm3, %v5863_v9  ;;  %v6696_v48 = vld [vmem:[#allocation20_spill] sm:$0xff] }
 0x1fd   :  { %v4654_v45 = vpop.eup %4653  ;;  %v1429_v14 = vadd.f32 0.5, %v1413_v54 }
 0x1fe   :  { %v1412_v27 = vmul.f32 0.5, %v4654_v45  ;;  %v3397_v31 = vadd.f32 %v3396_v10, %v3395_v26  ;;  %4124 = vmatmul.mubr.msk.f32.gmra.mrb[18].mxu1 %vm761_vm3, %v5878_v49 }
 0x1ff   :  { %v1445_v5 = vmul.f32 %v1429_v14, %v5782_v57  ;;  %4137 = vmatmul.mubr.msk.f32.gmra.mrb[18].mxu0 %vm761_vm3, %v5854_v8  ;;  %4146 = vmatprep.mubr.msk.f32.mxu1 %vm761_vm3, %v5670_v63  ;;  %v3385_v57 = vmul.f32 %v4805_v36, %v5779_v62 }
 0x200   :  { %v1428_v18 = vadd.f32 0.5, %v1412_v27  ;;  %4139 = vmatprep.mubr.msk.f32.mxu0 %vm761_vm3, %v5863_v9 }
 0x201   :  { %v3384_v47 = vmul.f32 %v4806_v16, %v1445_v5  ;;  %v3400_v55 = vsel %vm761_vm3, %v3385_v57, 0.0 }
 0x202   :  { %v1444_v32 = vmul.f32 %v1428_v18, %v5788_v41  ;;  %4147 = vmatmul.mubr.msk.f32.vlgmr.msra.gmra.mrb[20].mxu1 %vm761_vm3, %v5800_v46 }
 0x203   :  { %v3413_v52 = vsel %vm761_vm3, %v3384_v47, 0.0  ;;  %4140 = vmatmul.mubr.msk.f32.gmra.mrb[20].mxu0 %vm761_vm3, %v5878_v49  ;;  %4460 = vmatpush3.bf16.msra.mxu1 %v4457_v0 }
 0x204   :  { %v3383_v20 = vmul.f32 %v4806_v16, %v1444_v32  ;;  %v4465_v17 = vpack.c.bf16 %v1445_v5, %v1444_v32  ;;  %v3414_v53 = vadd.f32 %v3413_v52, %v3412_v12  ;;  %4162 = vmatprep.mubr.msk.f32.mxu0 %vm761_vm3, %v5670_v63  ;;  %4149 = vmatprep.mubr.msk.f32.mxu1 %vm761_vm3, %v5806_v61  ;;  %v6697_v32 = vld [vmem:[#allocation13_spill] sm:$0xff] }
 0x206   :  { %v3398_v41 = vsel %vm761_vm3, %v3383_v20, 0.0  ;;  %4466 = vmatprep.subr.bf16.mxu1 %v4465_v17  ;;  %v5903_v38 = vadd.f32 %v3415_v19, %v3414_v53  ;;  %4150 = vmatmul.mubr.msk.f32.gmra.mrb[22].mxu1 %vm761_vm3, %v5827_v51 }
 0x207   :  { %v3399_v62 = vadd.f32 %v3398_v41, %v3397_v31  ;;  %4163 = vmatmul.mubr.msk.f32.vlgmr.msra.gmra.mrb[22].mxu0 %vm761_vm3, %v5800_v46  ;;  %4152 = vmatprep.mubr.msk.f32.mxu1 %vm761_vm3, %v5833_v42 }
 0x208   :  { %6688 = vst [vmem:[#allocation15_spill] sm:$0xff] %v5903_v38  ;;  %4464 = vmatpush3.bf16.msra.mxu0 %v5811_v39  ;;  %4165 = vmatprep.mubr.msk.f32.mxu0 %vm761_vm3, %v5806_v61 }
 0x209   :  { %v5911_v13 = vadd.f32 %v3400_v55, %v3399_v62  ;;  %4470 = vmatprep.subr.bf16.mxu0 %v5815_v25 }
 0x20a   :  { %4153 = vmatmul.mubr.msk.f32.gmra.mrb[24].mxu1 %vm761_vm3, %v5854_v8 }
 0x20b   :  { %6689 = vst [vmem:[#allocation22_spill] sm:$0xff] %v5911_v13  ;;  %4166 = vmatmul.mubr.msk.f32.gmra.mrb[24].mxu0 %vm761_vm3, %v5827_v51  ;;  %4155 = vmatprep.mubr.msk.f32.mxu1 %vm761_vm3, %v5863_v9 }
 0x20c   :  { %4168 = vmatprep.mubr.msk.f32.mxu0 %vm761_vm3, %v5833_v42 }
 0x20e   :  { %4156 = vmatmul.mubr.msk.f32.gmra.mrb[26].mxu1 %vm761_vm3, %v5878_v49 }
 0x20f   :  { %4169 = vmatmul.mubr.msk.f32.gmra.mrb[26].mxu0 %vm761_vm3, %v5854_v8  ;;  %4178 = vmatprep.mubr.msk.f32.mxu1 %vm761_vm3, %v5670_v63 }
 0x210   :  { %4171 = vmatprep.mubr.msk.f32.mxu0 %vm761_vm3, %v5863_v9 }
 0x212   :  { %4179 = vmatmul.mubr.msk.f32.vlgmr.msra.gmra.mrb[28].mxu1 %vm761_vm3, %v5800_v46 }
 0x213   :  { %4172 = vmatmul.mubr.msk.f32.gmra.mrb[28].mxu0 %vm761_vm3, %v5878_v49  ;;  %4468 = vmatpush3.bf16.msra.mxu1 %v4465_v17 }
 0x214   :  { %4194 = vmatprep.mubr.msk.f32.mxu0 %vm761_vm3, %v5670_v63  ;;  %4181 = vmatprep.mubr.msk.f32.mxu1 %vm761_vm3, %v5806_v61 }
 0x215   :  { %4473 = vmatprep.subr.bf16.mxu1 %v6652_v2 }
 0x216   :  { %4182 = vmatmul.mubr.msk.f32.gmra.mrb[30].mxu1 %vm761_vm3, %v5827_v51 }
 0x217   :  { %4195 = vmatmul.mubr.msk.f32.vlgmr.msra.gmra.mrb[30].mxu0 %vm761_vm3, %v5800_v46  ;;  %4184 = vmatprep.mubr.msk.f32.mxu1 %vm761_vm3, %v5833_v42 }
 0x218   :  { %4472 = vmatpush3.bf16.msra.mxu0 %v5815_v25  ;;  %4197 = vmatprep.mubr.msk.f32.mxu0 %vm761_vm3, %v5806_v61 }
 0x219   :  { %4485 = vmatprep.subr.bf16.mxu0 %v6652_v2 }
 0x21a   :  { %4185 = vmatmul.mubr.msk.f32.gmra.mrb[32].mxu1 %vm761_vm3, %v5854_v8 }
 0x21b   :  { %4198 = vmatmul.mubr.msk.f32.gmra.mrb[32].mxu0 %vm761_vm3, %v5827_v51  ;;  %4187 = vmatprep.mubr.msk.f32.mxu1 %vm761_vm3, %v5863_v9 }
 0x21c   :  { %4200 = vmatprep.mubr.msk.f32.mxu0 %vm761_vm3, %v5833_v42 }
 0x21e   :  { %4188 = vmatmul.mubr.msk.f32.gmra.mrb[34].mxu1 %vm761_vm3, %v5878_v49 }
 0x21f   :  { %4201 = vmatmul.mubr.msk.f32.gmra.mrb[34].mxu0 %vm761_vm3, %v5854_v8  ;;  %4210 = vmatprep.mubr.msk.f32.mxu1 %vm761_vm3, %v5670_v63 }
 0x220   :  { %4203 = vmatprep.mubr.msk.f32.mxu0 %vm761_vm3, %v5863_v9 }
 0x222   :  { %4211 = vmatmul.mubr.msk.f32.vlgmr.msra.gmra.mrb[36].mxu1 %vm761_vm3, %v5800_v46 }
 0x223   :  { %4204 = vmatmul.mubr.msk.f32.gmra.mrb[36].mxu0 %vm761_vm3, %v5878_v49  ;;  %4213 = vmatprep.mubr.msk.f32.mxu1 %vm761_vm3, %v5806_v61 }
 0x224   :  { %4226 = vmatprep.mubr.msk.f32.mxu0 %vm761_vm3, %v5670_v63  ;;  %v6690_v63 = vmov 0.0  }
 0x226   :  { %4214 = vmatmul.mubr.msk.f32.gmra.mrb[38].mxu1 %vm761_vm3, %v5827_v51 }
 0x227   :  { %4227 = vmatmul.mubr.msk.f32.vlgmr.msra.gmra.mrb[38].mxu0 %vm761_vm3, %v5800_v46  ;;  %4216 = vmatprep.mubr.msk.f32.mxu1 %vm761_vm3, %v5833_v42 }
 0x228   :  { %4229 = vmatprep.mubr.msk.f32.mxu0 %vm761_vm3, %v5806_v61 }
 0x22a   :  { %4217 = vmatmul.mubr.msk.f32.gmra.mrb[40].mxu1 %vm761_vm3, %v5854_v8 }
 0x22b   :  { %4230 = vmatmul.mubr.msk.f32.gmra.mrb[40].mxu0 %vm761_vm3, %v5827_v51  ;;  %4219 = vmatprep.mubr.msk.f32.mxu1 %vm761_vm3, %v5863_v9 }
 0x22c   :  { %4232 = vmatprep.mubr.msk.f32.mxu0 %vm761_vm3, %v5833_v42 }
 0x22e   :  { %4220 = vmatmul.mubr.msk.f32.gmra.mrb[42].mxu1 %vm761_vm3, %v5878_v49 }
 0x22f   :  { %4233 = vmatmul.mubr.msk.f32.gmra.mrb[42].mxu0 %vm761_vm3, %v5854_v8  ;;  %4254 = vmatprep.mubr.msk.f32.mxu1 %vm4808_vm2, %v6690_v63  ;;  %v6695_v8 = vld [vmem:[#allocation21_spill] sm:$0xff] }
 0x230   :  { %4235 = vmatprep.mubr.msk.f32.mxu0 %vm761_vm3, %v5863_v9 }
 0x233   :  { %4236 = vmatmul.mubr.msk.f32.gmra.mrb[44].mxu0 %vm761_vm3, %v5878_v49 }
 0x234   :  { %4273 = vmatprep.mubr.msk.f32.mxu0 %vm4808_vm2, %v6690_v63 }
 0x2c4   :  { %v4116_v46 = vpop.f32.mrb[12].mxu1 }
 0x2c5   :  { %v6008_v28 = vadd.f32 %v4116_v46, %v6691_v21  ;;  %v1594_v37 = vpop.f32.mrb[13].mxu1 }
 0x2c6   :  { %v6011_v50 = vadd.f32 %v1594_v37, %v6692_v58 }
 0x2c7   :  { %v2369_v61 = vmul.f32 0.5, %v6008_v28 }
 0x2c8   :  { %v2368_v56 = vmul.f32 0.5, %v6011_v50 }
 0x2c9   :  { %v4119_v4 = vpop.f32.mrb[14].mxu1  ;;  %4655 = vtanh.f32 %v2369_v61 }
 0x2ca   :  { %v4132_v22 = vpop.f32.mrb[14].mxu0  ;;  %v6019_v6 = vadd.f32 %v4119_v4, %v6693_v43  ;;  %v1604_v35 = vpop.f32.mrb[15].mxu1  ;;  %4657 = vtanh.f32 %v2368_v56 }
 0x2cb   :  { %v6016_v39 = vadd.f32 %v4132_v22, %v6691_v21  ;;  %v1699_v25 = vpop.f32.mrb[15].mxu0  ;;  %v6026_v42 = vadd.f32 %v1604_v35, %v6694_v44 }
 0x2cc   :  { %v6022_v24 = vadd.f32 %v1699_v25, %v6692_v58  ;;  %v2371_v59 = vmul.f32 0.5, %v6019_v6 }
 0x2cd   :  { %v2377_v51 = vmul.f32 0.5, %v6016_v39  ;;  %v2370_v33 = vmul.f32 0.5, %v6026_v42  ;;  %v4122_v36 = vpop.f32.mrb[16].mxu1 }
 0x2ce   :  { %v2376_v7 = vmul.f32 0.5, %v6022_v24  ;;  %v4135_v3 = vpop.f32.mrb[16].mxu0  ;;  %v6035_v0 = vadd.f32 %v4122_v36, %v6695_v8  ;;  %v1614_v40 = vpop.f32.mrb[17].mxu1 }
 0x2cf   :  { %4659 = vtanh.f32 %v2377_v51  ;;  %v6032_v11 = vadd.f32 %v4135_v3, %v6693_v43  ;;  %v1709_v12 = vpop.f32.mrb[17].mxu0  ;;  %v6042_v54 = vadd.f32 %v1614_v40, %v6696_v48 }
 0x2d0   :  { %4661 = vtanh.f32 %v2371_v59  ;;  %v6038_v16 = vadd.f32 %v1709_v12, %v6694_v44  ;;  %v2373_v45 = vmul.f32 0.5, %v6035_v0 }
 0x2d1   :  { %4663 = vtanh.f32 %v2370_v33  ;;  %v2379_v9 = vmul.f32 0.5, %v6032_v11  ;;  %v2372_v14 = vmul.f32 0.5, %v6042_v54  ;;  %v4125_v27 = vpop.f32.mrb[18].mxu1 }
 0x2d2   :  { %4665 = vtanh.f32 %v2376_v7  ;;  %v2378_v26 = vmul.f32 0.5, %v6038_v16  ;;  %v4138_v10 = vpop.f32.mrb[18].mxu0  ;;  %v6051_v5 = vadd.f32 %v4125_v27, %v5511_v34  ;;  %v1624_v18 = vpop.f32.mrb[19].mxu1 }
 0x2d3   :  { %4667 = vtanh.f32 %v2379_v9  ;;  %v6048_v49 = vadd.f32 %v4138_v10, %v6695_v8  ;;  %v1719_v31 = vpop.f32.mrb[19].mxu0  ;;  %v6058_v57 = vadd.f32 %v1624_v18, %v6697_v32  ;;  %v4656_v52 = vpop.eup %4655 }
 0x2d4   :  { %4669 = vtanh.f32 %v2373_v45  ;;  %v6054_v15 = vadd.f32 %v1719_v31, %v6696_v48  ;;  %v2375_v20 = vmul.f32 0.5, %v6051_v5  ;;  %v4658_v19 = vpop.eup %4657  ;;  %v2497_v41 = vmul.f32 0.5, %v4656_v52 }
 0x2d5   :  { %4671 = vtanh.f32 %v2372_v14  ;;  %v2381_v47 = vmul.f32 0.5, %v6048_v49  ;;  %v2374_v62 = vmul.f32 0.5, %v6058_v57  ;;  %v4148_v46 = vpop.f32.mrb[20].mxu1  ;;  %v2496_v61 = vmul.f32 0.5, %v4658_v19 }
 0x2d6   :  { %4673 = vtanh.f32 %v2378_v26  ;;  %v2380_v17 = vmul.f32 0.5, %v6054_v15  ;;  %v4141_v53 = vpop.f32.mrb[20].mxu0  ;;  %v6067_v22 = vadd.f32 %v4148_v46, %v6691_v21  ;;  %v1804_v4 = vpop.f32.mrb[21].mxu1  ;;  %v2561_v35 = vadd.f32 0.5, %v2497_v41 }
 0x2d7   :  { %4675 = vtanh.f32 %v2381_v47  ;;  %v6064_v55 = vadd.f32 %v4141_v53, %v5511_v34  ;;  %v1729_v37 = vpop.f32.mrb[21].mxu0  ;;  %v6074_v59 = vadd.f32 %v1804_v4, %v6692_v58  ;;  %v2560_v3 = vadd.f32 0.5, %v2496_v61 }
 0x2d8   :  { %4677 = vtanh.f32 %v2375_v20  ;;  %v6070_v56 = vadd.f32 %v1729_v37, %v6697_v32  ;;  %v2385_v36 = vmul.f32 0.5, %v6067_v22  ;;  %v2625_v9 = vmul.f32 %v2561_v35, %v6008_v28 }
 0x2d9   :  { %v4660_v25 = vpop.eup %4659  ;;  %4679 = vtanh.f32 %v2374_v62  ;;  %v2383_v51 = vmul.f32 0.5, %v6064_v55  ;;  %v4151_v10 = vpop.f32.mrb[22].mxu1  ;;  %v2624_v31 = vmul.f32 %v2560_v3, %v6011_v50  ;;  %v2384_v28 = vmul.f32 0.5, %v6074_v59 }
 0x2da   :  { %v4662_v7 = vpop.eup %4661  ;;  %v2505_v33 = vmul.f32 0.5, %v4660_v25  ;;  %4681 = vtanh.f32 %v2380_v17  ;;  %v4164_v12 = vpop.f32.mrb[22].mxu0  ;;  %v2382_v26 = vmul.f32 0.5, %v6070_v56 }
 0x2db   :  { %v4664_v40 = vpop.eup %4663  ;;  %v2499_v45 = vmul.f32 0.5, %v4662_v7  ;;  %4683 = vtanh.f32 %v2383_v51  ;;  %v6079_v14 = vpop.f32.mrb[23].mxu0  ;;  %v4474_v41 = vpack.c.bf16 %v2625_v9, %v2624_v31  ;;  %v6101_v31 = vadd.f32 %v4164_v12, %v6691_v21 }
 0x2dc   :  { %v4666_v27 = vpop.eup %4665  ;;  %v2569_v18 = vadd.f32 0.5, %v2505_v33  ;;  %v2498_v47 = vmul.f32 0.5, %v4664_v40  ;;  %4685 = vtanh.f32 %v2385_v36  ;;  %v6082_v52 = vpop.f32.mrb[23].mxu1 }
 0x2dd   :  { %v4668_v20 = vpop.eup %4667  ;;  %v2563_v17 = vadd.f32 0.5, %v2499_v45  ;;  %v2504_v53 = vmul.f32 0.5, %v4666_v27  ;;  %4687 = vtanh.f32 %v2382_v26  ;;  %v6089_v51 = vpop.f32.mrb[24].mxu1  ;;  %4475 = vmatpush3.bf16.msra.mxu1 %v4474_v41 }
 0x2de   :  { %v4670_v19 = vpop.eup %4669  ;;  %v2633_v62 = vmul.f32 %v2569_v18, %v6016_v39  ;;  %v2562_v46 = vadd.f32 0.5, %v2498_v47  ;;  %v2507_v37 = vmul.f32 0.5, %v4668_v20  ;;  %v6086_v61 = vpop.f32.mrb[24].mxu0  ;;  %4689 = vtanh.f32 %v2384_v28  ;;  %4476 = vmatprep.subr.bf16.mxu1 %v6652_v2 }
 0x2df   :  { %v4672_v50 = vpop.eup %4671  ;;  %v2627_v4 = vmul.f32 %v2563_v17, %v6019_v6  ;;  %v2568_v25 = vadd.f32 0.5, %v2504_v53  ;;  %v2501_v35 = vmul.f32 0.5, %v4670_v19  ;;  %v6091_v7 = vpop.f32.mrb[25].mxu0  ;;  %v6095_v39 = vadd.f32 %v4151_v10, %v6693_v43 }
 0x2e0   :  { %v4674_v3 = vpop.eup %4673  ;;  %v2626_v33 = vmul.f32 %v2562_v46, %v6026_v42  ;;  %v2571_v36 = vadd.f32 0.5, %v2507_v37  ;;  %v2500_v40 = vmul.f32 0.5, %v4672_v50  ;;  %v6097_v9 = vpop.f32.mrb[25].mxu1 }
 0x2e1   :  { %v4676_v45 = vpop.eup %4675  ;;  %v2632_v6 = vmul.f32 %v2568_v25, %v6022_v24  ;;  %v2565_v26 = vadd.f32 0.5, %v2501_v35  ;;  %v2506_v27 = vmul.f32 0.5, %v4674_v3  ;;  %v6108_v46 = vpop.f32.mrb[26].mxu1 }
 0x2e2   :  { %v4678_v18 = vpop.eup %4677  ;;  %v4477_v42 = vpack.c.bf16 %v2627_v4, %v2626_v33  ;;  %v2635_v47 = vmul.f32 %v2571_v36, %v6032_v11  ;;  %v2564_v20 = vadd.f32 0.5, %v2500_v40  ;;  %v2509_v10 = vmul.f32 0.5, %v4676_v45  ;;  %v6105_v17 = vpop.f32.mrb[26].mxu0 }
 0x2e3   :  { %v4680_v53 = vpop.eup %4679  ;;  %v4486_v28 = vpack.c.bf16 %v2633_v62, %v2632_v6  ;;  %v2629_v19 = vmul.f32 %v2565_v26, %v6035_v0  ;;  %v2570_v24 = vadd.f32 0.5, %v2506_v27  ;;  %v2503_v41 = vmul.f32 0.5, %v4678_v18  ;;  %v6110_v12 = vpop.f32.mrb[27].mxu0 }
 0x2e4   :  { %v4682_v37 = vpop.eup %4681  ;;  %v2628_v50 = vmul.f32 %v2564_v20, %v6042_v54  ;;  %v2573_v4 = vadd.f32 0.5, %v2509_v10  ;;  %v2502_v25 = vmul.f32 0.5, %v4680_v53  ;;  %v2387_v11 = vmul.f32 0.5, %v6095_v39  ;;  %v6114_v35 = vpop.f32.mrb[27].mxu1  ;;  %4478 = vmatpush3.bf16.msra.mxu1 %v4477_v42 }
 0x2e5   :  { %v4684_v62 = vpop.eup %4683  ;;  %v2634_v0 = vmul.f32 %v2570_v24, %v6038_v16  ;;  %v2567_v3 = vadd.f32 0.5, %v2503_v41  ;;  %v2508_v33 = vmul.f32 0.5, %v4682_v37  ;;  %v2393_v36 = vmul.f32 0.5, %v6101_v31  ;;  %4487 = vmatpush3.bf16.msra.mxu0 %v4486_v28  ;;  %4479 = vmatprep.subr.bf16.mxu1 %v6652_v2  ;;  %v6124_v53 = vpop.f32.mrb[28].mxu1 }
 0x2e6   :  { %v4686_v40 = vpop.eup %4685  ;;  %v4480_v54 = vpack.c.bf16 %v2629_v19, %v2628_v50  ;;  %v2637_v45 = vmul.f32 %v2573_v4, %v6048_v49  ;;  %v2566_v6 = vadd.f32 0.5, %v2502_v25  ;;  %v2511_v26 = vmul.f32 0.5, %v4684_v62  ;;  %v6120_v27 = vpop.f32.mrb[28].mxu0  ;;  %4488 = vmatprep.subr.bf16.mxu0 %v6652_v2 }
 0x2e7   :  { %v4688_v18 = vpop.eup %4687  ;;  %v4489_v42 = vpack.c.bf16 %v2635_v47, %v2634_v0  ;;  %v2631_v16 = vmul.f32 %v2567_v3, %v6051_v5  ;;  %v2572_v20 = vadd.f32 0.5, %v2508_v33  ;;  %v2513_v10 = vmul.f32 0.5, %v4686_v40  ;;  %v6126_v28 = vpop.f32.mrb[29].mxu0 }
 0x2e8   :  { %v2630_v19 = vmul.f32 %v2566_v6, %v6058_v57  ;;  %v2575_v24 = vadd.f32 0.5, %v2511_v26  ;;  %v2510_v49 = vmul.f32 0.5, %v4688_v18  ;;  %4691 = vtanh.f32 %v2387_v11  ;;  %v6129_v41 = vpop.f32.mrb[29].mxu1  ;;  %4481 = vmatpush3.bf16.msra.mxu1 %v4480_v54  ;;  %v4690_v37 = vpop.eup %4689 }
 0x2e9   :  { %v2636_v50 = vmul.f32 %v2572_v20, %v6054_v15  ;;  %v2577_v47 = vadd.f32 0.5, %v2513_v10  ;;  %4693 = vtanh.f32 %v2393_v36  ;;  %v6134_v5 = vadd.f32 %v6082_v52, %v6694_v44  ;;  %4490 = vmatpush3.bf16.msra.mxu0 %v4489_v42  ;;  %4482 = vmatprep.subr.bf16.mxu1 %v6652_v2  ;;  %v6147_v33 = vpop.f32.mrb[30].mxu1 }
 0x2ea   :  { %v4483_v4 = vpack.c.bf16 %v2631_v16, %v2630_v19  ;;  %v2639_v57 = vmul.f32 %v2575_v24, %v6064_v55  ;;  %v2574_v25 = vadd.f32 0.5, %v2510_v49  ;;  %v2512_v11 = vmul.f32 0.5, %v4690_v37  ;;  %v6138_v62 = vpop.f32.mrb[30].mxu0  ;;  %4491 = vmatprep.subr.bf16.mxu0 %v6652_v2 }
 0x2eb   :  { %v4492_v0 = vpack.c.bf16 %v2637_v45, %v2636_v50  ;;  %v2641_v15 = vmul.f32 %v2577_v47, %v6067_v22  ;;  %v2386_v3 = vmul.f32 0.5, %v6134_v5  ;;  %v6145_v52 = vadd.f32 %v6079_v14, %v6692_v58  ;;  %v6149_v36 = vpop.f32.mrb[31].mxu0  ;;  %v6160_v45 = vpop.f32.mrb[31].mxu1  ;;  %v6165_v14 = vld [vmem:[%s6619_s7 + $0x108] sm:$0x1] }
 0x2ec   :  { %v2638_v55 = vmul.f32 %v2574_v25, %v6070_v56  ;;  %v2576_v40 = vadd.f32 0.5, %v2512_v11  ;;  %v6154_v54 = vadd.f32 %v6089_v51, %v6695_v8  ;;  %v6158_v22 = vadd.f32 %v6086_v61, %v6693_v43  ;;  %4484 = vmatpush3.bf16.msra.mxu1 %v4483_v4 }
 0x2ed   :  { %4695 = vtanh.f32 %v2386_v3  ;;  %v2392_v56 = vmul.f32 0.5, %v6145_v52  ;;  %v6170_v6 = vadd.f32 %v6097_v9, %v6696_v48  ;;  %v6174_v51 = vadd.f32 %v6091_v7, %v6694_v44  ;;  %4493 = vmatpush3.bf16.msra.mxu0 %v4492_v0  ;;  %4497 = vmatprep.subr.bf16.mxu1 %v6652_v2  ;;  %v4186_v10 = vpop.f32.mrb[32].mxu1 }
 0x2ee   :  { %v4495_v61 = vpack.c.bf16 %v2639_v57, %v2638_v55  ;;  %v2640_v26 = vmul.f32 %v2576_v40, %v6074_v59  ;;  %v2389_v18 = vmul.f32 0.5, %v6154_v54  ;;  %v2395_v42 = vmul.f32 0.5, %v6158_v22  ;;  %v6180_v16 = vpop.f32.mrb[32].mxu0  ;;  %4494 = vmatprep.subr.bf16.mxu0 %v6652_v2  ;;  %v6201_v37 = vpop.f32.mrb[33].mxu1 }
 0x2ef   :  { %4697 = vtanh.f32 %v2392_v56  ;;  %v2388_v9 = vmul.f32 0.5, %v6170_v6  ;;  %v2394_v7 = vmul.f32 0.5, %v6174_v51  ;;  %v6187_v20 = vadd.f32 %v6108_v46, %v5511_v34  ;;  %4255 = vmatmul.mubr.msk.f32.vlgmr.msra.gmra.mrb[44].mxu1 %vm2695_vm4, %v6165_v14  ;;  %v6191_v59 = vpop.f32.mrb[33].mxu0 }
 0x2f0   :  { %v4498_v19 = vpack.c.bf16 %v2641_v15, %v2640_v26  ;;  %4699 = vtanh.f32 %v2389_v18  ;;  %v6195_v24 = vadd.f32 %v6105_v17, %v6695_v8  ;;  %v6199_v49 = vadd.f32 %v6114_v35, %v6697_v32  ;;  %4292 = vmatprep.mubr.msk.f32.mxu1 %vm4808_vm2, %v6690_v63 }
 0x2f1   :  { %4701 = vtanh.f32 %v2395_v42  ;;  %v2391_v46 = vmul.f32 0.5, %v6187_v20  ;;  %v6208_v50 = vadd.f32 %v6110_v12, %v6696_v48  ;;  %v6212_v17 = vadd.f32 %v6120_v27, %v5511_v34  ;;  %4496 = vmatpush3.bf16.msra.mxu0 %v4495_v61  ;;  %v6225_v15 = vpop.f32.mrb[34].mxu1 }
 0x2f2   :  { %v4692_v47 = vpop.eup %4691  ;;  %4703 = vtanh.f32 %v2388_v9  ;;  %v2397_v35 = vmul.f32 0.5, %v6195_v24  ;;  %v2390_v4 = vmul.f32 0.5, %v6199_v49  ;;  %v6218_v57 = vadd.f32 %v6124_v53, %v6691_v21  ;;  %4499 = vmatpush3.bf16.msra.mxu1 %v4498_v19  ;;  %v6220_v25 = vpop.f32.mrb[34].mxu0  ;;  %4509 = vmatprep.subr.bf16.mxu0 %v6652_v2 }
 0x2f3   :  { %v4694_v12 = vpop.eup %4693  ;;  %v2515_v11 = vmul.f32 0.5, %v4692_v47  ;;  %4705 = vtanh.f32 %v2394_v7  ;;  %v2396_v27 = vmul.f32 0.5, %v6208_v50  ;;  %v2399_v0 = vmul.f32 0.5, %v6212_v17  ;;  %4500 = vmatprep.subr.bf16.mxu1 %v6652_v2  ;;  %v6228_v3 = vpop.f32.mrb[35].mxu0 }
 0x2f4   :  { %v2521_v53 = vmul.f32 0.5, %v4694_v12  ;;  %4707 = vtanh.f32 %v2391_v46  ;;  %v2401_v55 = vmul.f32 0.5, %v6218_v57  ;;  %v6233_v40 = vadd.f32 %v6126_v28, %v6697_v32  ;;  %4274 = vmatmul.mubr.msk.f32.vlgmr.msra.gmra.mrb[46].mxu0 %vm2695_vm4, %v6165_v14  ;;  %v6237_v56 = vpop.f32.mrb[35].mxu1 }
 0x2f5   :  { %v2579_v61 = vadd.f32 0.5, %v2515_v11  ;;  %4709 = vtanh.f32 %v2397_v35  ;;  %v6241_v26 = vadd.f32 %v6129_v41, %v6692_v58  ;;  %v6245_v18 = vadd.f32 %v6147_v33, %v6693_v43  ;;  %4311 = vmatprep.mubr.msk.f32.mxu0 %vm4808_vm2, %v6690_v63  ;;  %v6259_v47 = vpop.f32.mrb[36].mxu1 }
 0x2f6   :  { %v2585_v28 = vadd.f32 0.5, %v2521_v53  ;;  %4711 = vtanh.f32 %v2390_v4  ;;  %v2398_v42 = vmul.f32 0.5, %v6233_v40  ;;  %v6252_v9 = vadd.f32 %v6138_v62, %v6691_v21  ;;  %v6254_v7 = vpop.f32.mrb[36].mxu0  ;;  %v6267_v11 = vpop.f32.mrb[37].mxu1 }
 0x2f7   :  { %v4696_v19 = vpop.eup %4695  ;;  %v2643_v41 = vmul.f32 %v2579_v61, %v6095_v39  ;;  %4713 = vtanh.f32 %v2396_v27  ;;  %v2400_v33 = vmul.f32 0.5, %v6241_v26  ;;  %v2403_v46 = vmul.f32 0.5, %v6245_v18  ;;  %v6261_v35 = vpop.f32.mrb[37].mxu0 }
 0x2f8   :  { %v6264_v4 = vmul.f32 %v2585_v28, %v6101_v31  ;;  %v2514_v12 = vmul.f32 0.5, %v4696_v19  ;;  %4715 = vtanh.f32 %v2399_v0  ;;  %v2409_v62 = vmul.f32 0.5, %v6252_v9 }
 0x2f9   :  { %v4698_v53 = vpop.eup %4697  ;;  %4717 = vtanh.f32 %v2401_v55  ;;  %v6271_v39 = vadd.f32 %v6160_v45, %v6694_v44  ;;  %v6275_v27 = vadd.f32 %v6149_v36, %v6692_v58  ;;  %v6278_v61 = vadd.f32 %v4186_v10, %v6695_v8  ;;  %v6288_v2 = vpop.f32.mrb[38].mxu1 }
 0x2fa   :  { %v4700_v31 = vpop.eup %4699  ;;  %v2578_v28 = vadd.f32 0.5, %v2514_v12  ;;  %v2520_v0 = vmul.f32 0.5, %v4698_v53  ;;  %4719 = vtanh.f32 %v2398_v42  ;;  %v6282_v19 = vadd.f32 %v6180_v16, %v6693_v43  ;;  %v6284_v55 = vpop.f32.mrb[38].mxu0  ;;  %6699 = vst [vmem:[#allocation16_spill] sm:$0xff] %v6288_v2 }
 0x2fb   :  { %6698 = vst [vmem:[#allocation17_spill] sm:$0xff] %v6284_v55  ;;  %v4702_v30 = vpop.eup %4701  ;;  %v2517_v45 = vmul.f32 0.5, %v4700_v31  ;;  %4721 = vtanh.f32 %v2400_v33  ;;  %v2402_v23 = vmul.f32 0.5, %v6271_v39  ;;  %v2408_v36 = vmul.f32 0.5, %v6275_v27  ;;  %v6290_v10 = vpop.f32.mrb[39].mxu0 }
 0x2fc   :  { %6700 = vst [vmem:[#allocation18_spill] sm:$0xff] %v6290_v10  ;;  %v4704_v12 = vpop.eup %4703  ;;  %v2642_v42 = vmul.f32 %v2578_v28, %v6134_v5  ;;  %v2584_v53 = vadd.f32 0.5, %v2520_v0  ;;  %v2523_v29 = vmul.f32 0.5, %v4702_v30  ;;  %4723 = vtanh.f32 %v2403_v46  ;;  %v6293_v16 = vpop.f32.mrb[39].mxu1 }
 0x2fd   :  { %v4706_v13 = vpop.eup %4705  ;;  %v2581_v38 = vadd.f32 0.5, %v2517_v45  ;;  %v2516_v31 = vmul.f32 0.5, %v4704_v12  ;;  %4725 = vtanh.f32 %v2409_v62  ;;  %v2405_v33 = vmul.f32 0.5, %v6278_v61  ;;  %v6300_v0 = vpop.f32.mrb[40].mxu1 }
 0x2fe   :  { %v4708_v60 = vpop.eup %4707  ;;  %v4501_v1 = vpack.c.bf16 %v2643_v41, %v2642_v42  ;;  %v2648_v55 = vmul.f32 %v2584_v53, %v6145_v52  ;;  %v2587_v2 = vadd.f32 0.5, %v2523_v29  ;;  %v2522_v10 = vmul.f32 0.5, %v4706_v13  ;;  %v6297_v43 = vpop.f32.mrb[40].mxu0 }
 0x2ff   :  { %v4710_v5 = vpop.eup %4709  ;;  %v2645_v30 = vmul.f32 %v2581_v38, %v6154_v54  ;;  %v2580_v46 = vadd.f32 0.5, %v2516_v31  ;;  %v2519_v28 = vmul.f32 0.5, %v4708_v60  ;;  %4727 = vtanh.f32 %v2402_v23  ;;  %v6302_v45 = vpop.f32.mrb[41].mxu0 }
 0x300   :  { %6701 = vst [vmem:[#allocation21_spill] sm:$0xff] %v6302_v45  ;;  %v4712_v62 = vpop.eup %4711  ;;  %v4510_v12 = vpack.c.bf16 %v6264_v4, %v2648_v55  ;;  %v2651_v41 = vmul.f32 %v2587_v2, %v6158_v22  ;;  %v2586_v52 = vadd.f32 0.5, %v2522_v10  ;;  %v2525_v29 = vmul.f32 0.5, %v4710_v5  ;;  %4502 = vmatpush3.bf16.msra.mxu1 %v4501_v1  ;;  %v6306_v13 = vpop.f32.mrb[41].mxu1 }
 0x301   :  { %v4714_v42 = vpop.eup %4713  ;;  %v2644_v38 = vmul.f32 %v2580_v46, %v6170_v6  ;;  %v2583_v54 = vadd.f32 0.5, %v2519_v28  ;;  %v2518_v60 = vmul.f32 0.5, %v4712_v62  ;;  %4729 = vtanh.f32 %v2408_v36  ;;  %v6315_v36 = vpop.f32.mrb[42].mxu1 }
 0x302   :  { %v6702_v23 = vmov 0.0|0.0   ;;  %v4716_v53 = vpop.eup %4715  ;;  %v2650_v31 = vmul.f32 %v2586_v52, %v6174_v51  ;;  %v2589_v45 = vadd.f32 0.5, %v2525_v29  ;;  %v2524_v4 = vmul.f32 0.5, %v4714_v42  ;;  %4511 = vmatpush3.bf16.msra.mxu0 %v4510_v12  ;;  %v6311_v2 = vpop.f32.mrb[42].mxu0 }
 0x303   :  { %4503 = vmatprep.subr.bf16.mxu1 %v6702_v23  ;;  %4731 = vtanh.f32 %v2405_v33  ;;  %v4718_v1 = vpop.eup %4717  ;;  %v4504_v22 = vpack.c.bf16 %v2645_v30, %v2644_v38  ;;  %v2647_v55 = vmul.f32 %v2583_v54, %v6187_v20  ;;  %v2582_v10 = vadd.f32 0.5, %v2518_v60  ;;  %4512 = vmatprep.subr.bf16.mxu0 %v6702_v23  ;;  %v6317_v5 = vpop.f32.mrb[43].mxu0 }
 0x304   :  { %v2527_v6 = vmul.f32 0.5, %v4716_v53  ;;  %v4720_v46 = vpop.eup %4719  ;;  %v4513_v51 = vpack.c.bf16 %v2651_v41, %v2650_v31  ;;  %v2653_v28 = vmul.f32 %v2589_v45, %v6195_v24  ;;  %v2588_v33 = vadd.f32 0.5, %v2524_v4  ;;  %v6320_v12 = vpop.f32.mrb[43].mxu1 }
 0x305   :  { %v2529_v62 = vmul.f32 0.5, %v4718_v1  ;;  %v4722_v52 = vpop.eup %4721  ;;  %v2646_v30 = vmul.f32 %v2582_v10, %v6199_v49  ;;  %v2526_v29 = vmul.f32 0.5, %v4720_v46  ;;  %v2411_v42 = vmul.f32 0.5, %v6282_v19  ;;  %4505 = vmatpush3.bf16.msra.mxu1 %v4504_v22 }
 0x306   :  { %v2591_v20 = vadd.f32 0.5, %v2527_v6  ;;  %v4724_v38 = vpop.eup %4723  ;;  %v2652_v54 = vmul.f32 %v2588_v33, %v6208_v50  ;;  %v2528_v53 = vmul.f32 0.5, %v4722_v52  ;;  %v6327_v24 = vadd.f32 %v6201_v37, %v6696_v48  ;;  %4514 = vmatpush3.bf16.msra.mxu0 %v4513_v51  ;;  %4506 = vmatprep.subr.bf16.mxu1 %v6702_v23  ;;  %v6330_v45 = vpop.f32.mrb[44].mxu0 }
 0x307   :  { %v2593_v60 = vadd.f32 0.5, %v2529_v62  ;;  %v4726_v49 = vpop.eup %4725  ;;  %v4507_v41 = vpack.c.bf16 %v2647_v55, %v2646_v30  ;;  %v2590_v4 = vadd.f32 0.5, %v2526_v29  ;;  %v2531_v1 = vmul.f32 0.5, %v4724_v38  ;;  %4515 = vmatprep.subr.bf16.mxu0 %v6702_v23  ;;  %v6334_v50 = vpop.f32.mrb[45].mxu0 }
 0x308   :  { %v2655_v31 = vmul.f32 %v2591_v20, %v6212_v17  ;;  %v4516_v22 = vpack.c.bf16 %v2653_v28, %v2652_v54  ;;  %v2592_v37 = vadd.f32 0.5, %v2528_v53  ;;  %v2537_v6 = vmul.f32 0.5, %v4726_v49 }
 0x309   :  { %v2657_v10 = vmul.f32 %v2593_v60, %v6218_v57  ;;  %v4728_v46 = vpop.eup %4727  ;;  %v2654_v51 = vmul.f32 %v2590_v4, %v6233_v40  ;;  %v2595_v33 = vadd.f32 0.5, %v2531_v1  ;;  %4733 = vtanh.f32 %v2411_v42  ;;  %4508 = vmatpush3.bf16.msra.mxu1 %v4507_v41 }
 0x30a   :  { %v2404_v55 = vmul.f32 0.5, %v6327_v24  ;;  %v2656_v17 = vmul.f32 %v2592_v37, %v6241_v26  ;;  %v2601_v62 = vadd.f32 0.5, %v2537_v6  ;;  %v2530_v52 = vmul.f32 0.5, %v4728_v46  ;;  %4517 = vmatpush3.bf16.msra.mxu0 %v4516_v22  ;;  %4521 = vmatprep.subr.bf16.mxu1 %v6702_v23  ;;  %v6703_v46 = vld [vmem:[#allocation19_spill] sm:$0xff] }
 0x30b   :  { %v6342_v30 = vadd.f32 %v6191_v59, %v6694_v44  ;;  %v4730_v57 = vpop.eup %4729  ;;  %v4519_v28 = vpack.c.bf16 %v2655_v31, %v2654_v51  ;;  %v2659_v40 = vmul.f32 %v2595_v33, %v6245_v18  ;;  %v6348_v20 = vadd.f32 %v6225_v15, %v5511_v34  ;;  %4518 = vmatprep.subr.bf16.mxu0 %v6702_v23  ;;  %v6704_v51 = vld [vmem:[#allocation16_spill] sm:$0xff] }
 0x30c   :  { %4735 = vtanh.f32 %v2404_v55  ;;  %v4522_v29 = vpack.c.bf16 %v2657_v10, %v2656_v17  ;;  %v2665_v42 = vmul.f32 %v2601_v62, %v6252_v9  ;;  %v2594_v59 = vadd.f32 0.5, %v2530_v52  ;;  %4293 = vmatmul.mubr.msk.f32.vlgmr.msra.gmra.mrb[46].mxu1 %vm2695_vm4, %v6165_v14 }
 0x30d   :  { %v4732_v26 = vpop.eup %4731  ;;  %v2536_v38 = vmul.f32 0.5, %v4730_v57  ;;  %v2410_v60 = vmul.f32 0.5, %v6342_v30  ;;  %v2407_v18 = vmul.f32 0.5, %v6348_v20  ;;  %v6358_v15 = vadd.f32 %v6220_v25, %v6695_v8  ;;  %4330 = vmatprep.mubr.msk.f32.mxu1 %vm4808_vm2, %v6690_v63 }
 0x30e   :  { %v2533_v54 = vmul.f32 0.5, %v4732_v26  ;;  %v2658_v53 = vmul.f32 %v2594_v59, %v6271_v39  ;;  %v6365_v49 = vadd.f32 %v6237_v56, %v6697_v32  ;;  %v6369_v41 = vadd.f32 %v6228_v3, %v6696_v48  ;;  %4520 = vmatpush3.bf16.msra.mxu0 %v4519_v28  ;;  %4523 = vmatpush3.bf16.msra.mxu1 %v4522_v29  ;;  %v6706_v29 = vld [vmem:[#allocation18_spill] sm:$0xff] }
 0x30f   :  { %v2600_v9 = vadd.f32 0.5, %v2536_v38  ;;  %4737 = vtanh.f32 %v2410_v60  ;;  %v2413_v25 = vmul.f32 0.5, %v6358_v15  ;;  %v6374_v4 = vadd.f32 %v6254_v7, %v5511_v34  ;;  %4524 = vmatprep.subr.bf16.mxu1 %v6702_v23  ;;  %4533 = vmatprep.subr.bf16.mxu0 %v6702_v23 }
 0x310   :  { %v2597_v31 = vadd.f32 0.5, %v2533_v54  ;;  %v4525_v56 = vpack.c.bf16 %v2659_v40, %v2658_v53  ;;  %4739 = vtanh.f32 %v2407_v18  ;;  %v2406_v3 = vmul.f32 0.5, %v6365_v49 }
 0x311   :  { %v2664_v39 = vmul.f32 %v2600_v9, %v6275_v27  ;;  %4741 = vtanh.f32 %v2413_v25  ;;  %v2412_v22 = vmul.f32 0.5, %v6369_v41  ;;  %v2415_v10 = vmul.f32 0.5, %v6374_v4  ;;  %4312 = vmatmul.mubr.msk.f32.vlgmr.msra.gmra.mrb[48].mxu0 %vm2695_vm4, %v6165_v14 }
 0x312   :  { %v6381_v1 = vmul.f32 %v2597_v31, %v6278_v61  ;;  %4743 = vtanh.f32 %v2406_v3  ;;  %v6389_v37 = vadd.f32 %v6259_v47, %v6691_v21  ;;  %v6393_v27 = vadd.f32 %v6261_v35, %v6697_v32  ;;  %4526 = vmatpush3.bf16.msra.mxu1 %v4525_v56  ;;  %4349 = vmatprep.mubr.msk.f32.mxu0 %vm4808_vm2, %v6690_v63  ;;  %v6705_v47 = vld [vmem:[#allocation17_spill] sm:$0xff] }
 0x313   :  { %v4534_v7 = vpack.c.bf16 %v2665_v42, %v2664_v39  ;;  %v4734_v61 = vpop.eup %4733  ;;  %4745 = vtanh.f32 %v2412_v22  ;;  %v6399_v6 = vadd.f32 %v6267_v11, %v6692_v58  ;;  %v6403_v33 = vadd.f32 %v6704_v51, %v6703_v46  ;;  %4527 = vmatprep.subr.bf16.mxu1 %v6702_v23 }
 0x314   :  { %v6407_v55 = vadd.f32 %v6705_v47, %v6691_v21  ;;  %v2539_v35 = vmul.f32 0.5, %v4734_v61  ;;  %4747 = vtanh.f32 %v2415_v10  ;;  %v2417_v17 = vmul.f32 0.5, %v6389_v37 }
 0x315   :  { %v2414_v62 = vmul.f32 0.5, %v6393_v27  ;;  %4535 = vmatpush3.bf16.msra.mxu0 %v4534_v7  ;;  %v2416_v11 = vmul.f32 0.5, %v6399_v6  ;;  %v2419_v57 = vmul.f32 0.5, %v6403_v33  ;;  %v6417_v21 = vadd.f32 %v6293_v16, %v6694_v44 }
 0x316   :  { %v4736_v52 = vpop.eup %4735  ;;  %v2425_v28 = vmul.f32 0.5, %v6407_v55  ;;  %4536 = vmatprep.subr.bf16.mxu0 %v6702_v23  ;;  %v2603_v40 = vadd.f32 0.5, %v2539_v35  ;;  %4749 = vtanh.f32 %v2417_v17  ;;  %v6422_v42 = vadd.f32 %v6706_v29, %v6692_v58 }
 0x317   :  { %v2532_v26 = vmul.f32 0.5, %v4736_v52  ;;  %4751 = vtanh.f32 %v2414_v62  ;;  %v2418_v59 = vmul.f32 0.5, %v6417_v21  ;;  %v6427_v38 = vadd.f32 %v6300_v0, %v6695_v8 }
 0x318   :  { %v6431_v16 = vadd.f32 %v6297_v43, %v6703_v46  ;;  %v2667_v54 = vmul.f32 %v2603_v40, %v6282_v19  ;;  %4753 = vtanh.f32 %v2416_v11  ;;  %v2424_v18 = vmul.f32 0.5, %v6422_v42  ;;  %v6707_v19 = vld [vmem:[#allocation21_spill] sm:$0xff] }
 0x319   :  { %v2596_v60 = vadd.f32 0.5, %v2532_v26  ;;  %v4738_v53 = vpop.eup %4737  ;;  %4755 = vtanh.f32 %v2419_v57  ;;  %v2421_v58 = vmul.f32 0.5, %v6427_v38  ;;  %v6439_v0 = vadd.f32 %v6306_v13, %v6696_v48 }
 0x31a   :  { %v2427_v9 = vmul.f32 0.5, %v6431_v16  ;;  %v4740_v31 = vpop.eup %4739  ;;  %v2538_v25 = vmul.f32 0.5, %v4738_v53  ;;  %4757 = vtanh.f32 %v2425_v28  ;;  %v6444_v56 = vadd.f32 %v6707_v19, %v6694_v44 }
 0x31b   :  { %v2660_v43 = vmul.f32 %v2596_v60, %v6327_v24  ;;  %v4742_v39 = vpop.eup %4741  ;;  %v2535_v3 = vmul.f32 0.5, %v4740_v31  ;;  %4759 = vtanh.f32 %v2418_v59  ;;  %v2420_v22 = vmul.f32 0.5, %v6439_v0 }
 0x31c   :  { %v6449_v10 = vadd.f32 %v6315_v36, %v5511_v34  ;;  %v4744_v13 = vpop.eup %4743  ;;  %v2602_v61 = vadd.f32 0.5, %v2538_v25  ;;  %v2541_v24 = vmul.f32 0.5, %v4742_v39  ;;  %4761 = vtanh.f32 %v2424_v18 }
 0x31d   :  { %v4528_v7 = vpack.c.bf16 %v6381_v1, %v2660_v43  ;;  %v4746_v46 = vpop.eup %4745  ;;  %v2599_v51 = vadd.f32 0.5, %v2535_v3  ;;  %v2534_v47 = vmul.f32 0.5, %v4744_v13  ;;  %4763 = vtanh.f32 %v2421_v58 }
 0x31e   :  { %v2426_v44 = vmul.f32 0.5, %v6444_v56  ;;  %v4748_v35 = vpop.eup %4747  ;;  %v2666_v17 = vmul.f32 %v2602_v61, %v6342_v30  ;;  %v2605_v62 = vadd.f32 0.5, %v2541_v24  ;;  %v2540_v52 = vmul.f32 0.5, %v4746_v46 }
 0x31f   :  { %4765 = vtanh.f32 %v2427_v9  ;;  %4529 = vmatpush3.bf16.msra.mxu1 %v4528_v7  ;;  %v2663_v36 = vmul.f32 %v2599_v51, %v6348_v20  ;;  %v2598_v11 = vadd.f32 0.5, %v2534_v47  ;;  %v2543_v1 = vmul.f32 0.5, %v4748_v35 }
 0x320   :  { %4767 = vtanh.f32 %v2420_v22  ;;  %4530 = vmatprep.subr.bf16.mxu1 %v6702_v23  ;;  %v4750_v57 = vpop.eup %4749  ;;  %v4537_v28 = vpack.c.bf16 %v2667_v54, %v2666_v17  ;;  %v2669_v40 = vmul.f32 %v2605_v62, %v6358_v15  ;;  %v2604_v26 = vadd.f32 0.5, %v2540_v52 }
 0x321   :  { %4769 = vtanh.f32 %v2426_v44  ;;  %v4752_v29 = vpop.eup %4751  ;;  %v2662_v30 = vmul.f32 %v2598_v11, %v6365_v49  ;;  %v2607_v59 = vadd.f32 0.5, %v2543_v1  ;;  %v2545_v60 = vmul.f32 0.5, %v4750_v57 }
 0x322   :  { %v2423_v18 = vmul.f32 0.5, %v6449_v10  ;;  %v4754_v53 = vpop.eup %4753  ;;  %v2668_v20 = vmul.f32 %v2604_v26, %v6369_v41  ;;  %v2542_v58 = vmul.f32 0.5, %v4752_v29  ;;  %v6462_v9 = vadd.f32 %v6311_v2, %v6695_v8  ;;  %4538 = vmatpush3.bf16.msra.mxu0 %v4537_v28 }
 0x323   :  { %v6466_v15 = vadd.f32 %v6320_v12, %v6697_v32  ;;  %v4756_v54 = vpop.eup %4755  ;;  %v4531_v31 = vpack.c.bf16 %v2663_v36, %v2662_v30  ;;  %v2671_v49 = vmul.f32 %v2607_v59, %v6374_v4  ;;  %v2609_v43 = vadd.f32 0.5, %v2545_v60  ;;  %4539 = vmatprep.subr.bf16.mxu0 %v6702_v23 }
 0x324   :  { %v2544_v25 = vmul.f32 0.5, %v4754_v53  ;;  %v4758_v19 = vpop.eup %4757  ;;  %v4540_v41 = vpack.c.bf16 %v2669_v40, %v2668_v20  ;;  %v2606_v39 = vadd.f32 0.5, %v2542_v58  ;;  %v2547_v3 = vmul.f32 0.5, %v4756_v54 }
 0x325   :  { %4771 = vtanh.f32 %v2423_v18  ;;  %v4760_v8 = vpop.eup %4759  ;;  %v2673_v2 = vmul.f32 %v2609_v43, %v6389_v37  ;;  %v2553_v12 = vmul.f32 0.5, %v4758_v19  ;;  %v2429_v13 = vmul.f32 0.5, %v6462_v9  ;;  %4532 = vmatpush3.bf16.msra.mxu1 %v4531_v31 }
 0x326   :  { %v2608_v22 = vadd.f32 0.5, %v2544_v25  ;;  %v4762_v7 = vpop.eup %4761  ;;  %v2670_v4 = vmul.f32 %v2606_v39, %v6393_v27  ;;  %v2611_v61 = vadd.f32 0.5, %v2547_v3  ;;  %v2546_v24 = vmul.f32 0.5, %v4760_v8  ;;  %4541 = vmatpush3.bf16.msra.mxu0 %v4540_v41  ;;  %4545 = vmatprep.subr.bf16.mxu1 %v6702_v23 }
 0x327   :  { %v2422_v46 = vmul.f32 0.5, %v6466_v15  ;;  %v4764_v51 = vpop.eup %4763  ;;  %v2617_v44 = vadd.f32 0.5, %v2553_v12  ;;  %v2552_v37 = vmul.f32 0.5, %v4762_v7  ;;  %4773 = vtanh.f32 %v2429_v13  ;;  %4542 = vmatprep.subr.bf16.mxu0 %v6702_v23 }
 0x328   :  { %v2672_v47 = vmul.f32 %v2608_v22, %v6399_v6  ;;  %v4543_v17 = vpack.c.bf16 %v2671_v49, %v2670_v4  ;;  %v2675_v62 = vmul.f32 %v2611_v61, %v6403_v33  ;;  %v2610_v27 = vadd.f32 0.5, %v2546_v24  ;;  %4331 = vmatmul.mubr.msk.f32.vlgmr.msra.gmra.mrb[48].mxu1 %vm2695_vm4, %v6165_v14 }
 0x329   :  { %v4766_v35 = vpop.eup %4765  ;;  %v2549_v52 = vmul.f32 0.5, %v4764_v51  ;;  %v2681_v1 = vmul.f32 %v2617_v44, %v6407_v55  ;;  %v2616_v57 = vadd.f32 0.5, %v2552_v37  ;;  %4368 = vmatprep.mubr.msk.f32.mxu1 %vm4808_vm2, %v6690_v63  ;;  %4775 = vtanh.f32 %v2422_v46  ;;  %v6708_v37 = vld [vmem:[#allocation14_spill] sm:$0xff] }
 0x32a   :  { %v4768_v36 = vpop.eup %4767  ;;  %v4546_v11 = vpack.c.bf16 %v2673_v2, %v2672_v47  ;;  %v2555_v6 = vmul.f32 0.5, %v4766_v35  ;;  %v2674_v40 = vmul.f32 %v2610_v27, %v6417_v21  ;;  %4544 = vmatpush3.bf16.msra.mxu0 %v4543_v17  ;;  %v2350_v60 = vadd.f32 %v6317_v5, %v6696_v48  ;;  %v6709_v35 = vld [vmem:[#allocation12_spill] sm:$0xff]  ;;  %v6711_v27 = vld [vmem:[#allocation15_spill] sm:$0xff] }
 0x32b   :  { %v4770_v28 = vpop.eup %4769  ;;  %v2613_v26 = vadd.f32 0.5, %v2549_v52  ;;  %v2548_v29 = vmul.f32 0.5, %v4768_v36  ;;  %v2680_v33 = vmul.f32 %v2616_v57, %v6422_v42  ;;  %4557 = vmatprep.subr.bf16.mxu0 %v6702_v23  ;;  %v2365_v21 = vadd.f32 %v6330_v45, %v5511_v34  ;;  %v6712_v52 = vld [vmem:[#allocation22_spill] sm:$0xff] }
 0x32c   :  { %v2619_v30 = vadd.f32 0.5, %v2555_v6  ;;  %v2554_v59 = vmul.f32 0.5, %v4770_v28  ;;  %4547 = vmatpush3.bf16.msra.mxu1 %v4546_v11  ;;  %v4549_v55 = vpack.c.bf16 %v2675_v62, %v2674_v40  ;;  %v2428_v54 = vmul.f32 0.5, %v2350_v60  ;;  %v3528_v11 = vld [vmem:[%s6619_s7 + $0x138] sm:$0x3f] }
 0x32d   :  { %v2677_v18 = vmul.f32 %v2613_v26, %v6427_v38  ;;  %v2612_v53 = vadd.f32 0.5, %v2548_v29  ;;  %4548 = vmatprep.subr.bf16.mxu1 %v6702_v23  ;;  %v4558_v20 = vpack.c.bf16 %v2681_v1, %v2680_v33  ;;  %4350 = vmatmul.mubr.msk.f32.vlgmr.msra.gmra.mrb[50].mxu0 %vm2695_vm4, %v6165_v14  ;;  %v2431_v31 = vmul.f32 0.5, %v2365_v21  ;;  %v6536_v1 = vpop.permute.xlu1 %2692  ;;  %v6714_v26 = vld [vmem:[#allocation11_spill] sm:$0xff] }
 0x32e   :  { %v2683_v42 = vmul.f32 %v2619_v30, %v6431_v16  ;;  %v2618_v58 = vadd.f32 0.5, %v2554_v59  ;;  %v2360_v38 = vadd.f32 %v6334_v50, %v6697_v32  ;;  %4387 = vmatprep.mubr.msk.f32.mxu0 %vm4808_vm2, %v6690_v63  ;;  %4777 = vtanh.f32 %v2428_v54  ;;  %v4790_v30 = vld [vmem:[%s6624_s6 + $0x1] sm:$0x1] }
 0x32f   :  { %v4772_v48 = vpop.eup %4771  ;;  %v2676_v5 = vmul.f32 %v2612_v53, %v6439_v0  ;;  %4559 = vmatpush3.bf16.msra.mxu0 %v4558_v20  ;;  %4779 = vtanh.f32 %v2431_v31  ;;  %v6710_v17 = vpack.c.bf16 %v6708_v37, %v6709_v35  ;;  %v6713_v36 = vpack.c.bf16 %v6711_v27, %v6712_v52  ;;  %v6716_v53 = vld [vmem:[#allocation5_spill] sm:$0xff]  ;;  %v4791_v31 = vld [vmem:[%s6624_s6 + $0x2] sm:$0x1] }
 0x330   :  { %v2682_v34 = vmul.f32 %v2618_v58, %v6444_v56  ;;  %v2551_v45 = vmul.f32 0.5, %v4772_v48  ;;  %4550 = vmatpush3.bf16.msra.mxu1 %v4549_v55  ;;  %v2430_v49 = vmul.f32 0.5, %v2360_v38  ;;  %4560 = vmatprep.subr.bf16.mxu0 %v6702_v23 }
 0x331   :  { %v4552_v16 = vpack.c.bf16 %v2677_v18, %v2676_v5  ;;  %4551 = vmatprep.subr.bf16.mxu1 %v6702_v23  ;;  %v4774_v0 = vpop.eup %4773 }
 0x332   :  { %v4561_v43 = vpack.c.bf16 %v2683_v42, %v2682_v34  ;;  %4781 = vtanh.f32 %v2430_v49  ;;  %v2615_v32 = vadd.f32 0.5, %v2551_v45  ;;  %v2557_v25 = vmul.f32 0.5, %v4774_v0  ;;  %v6717_v0 = vld [vmem:[#allocation7_spill] sm:$0xff] }
 0x333   :  { %v4776_v50 = vpop.eup %4775 }
 0x334   :  { %4553 = vmatpush3.bf16.msra.mxu1 %v4552_v16  ;;  %4562 = vmatpush3.bf16.msra.mxu0 %v4561_v43  ;;  %v2550_v56 = vmul.f32 0.5, %v4776_v50  ;;  %v2679_v19 = vmul.f32 %v2615_v32, %v6449_v10  ;;  %v2621_v39 = vadd.f32 0.5, %v2557_v25  ;;  %v4792_v32 = vld [vmem:[%s6624_s6 + $0x3] sm:$0x1] }
 0x335   :  { %4554 = vmatprep.subr.bf16.mxu1 %v6702_v23  ;;  %4563 = vmatprep.subr.bf16.mxu0 %v6702_v23 }
 0x336   :  { %v2614_v41 = vadd.f32 0.5, %v2550_v56  ;;  %v2685_v4 = vmul.f32 %v2621_v39, %v6462_v9  ;;  %v3417_v9 = vld [vmem:[%s6619_s7 + $0x128] sm:$0x1] }
 0x338   :  { %v4778_v3 = vpop.eup %4777  ;;  %v2678_v8 = vmul.f32 %v2614_v41, %v6466_v15  ;;  %v6718_v41 = vld [vmem:[#allocation8_spill] sm:$0xff] }
 0x339   :  { %v4780_v2 = vpop.eup %4779  ;;  %v2556_v22 = vmul.f32 0.5, %v4778_v3 }
 0x33a   :  { %v4555_v12 = vpack.c.bf16 %v2679_v19, %v2678_v8  ;;  %v2559_v13 = vmul.f32 0.5, %v4780_v2 }
 0x33b   :  { %v2620_v61 = vadd.f32 0.5, %v2556_v22 }
 0x33c   :  { %v4782_v7 = vpop.eup %4781  ;;  %v2623_v24 = vadd.f32 0.5, %v2559_v13  ;;  %4556 = vmatpush3.bf16.msra.mxu1 %v4555_v12  ;;  %v4793_v13 = vld [vmem:[%s6624_s6 + $0x4] sm:$0x1] }
 0x33d   :  { %v2558_v46 = vmul.f32 0.5, %v4782_v7  ;;  %v2684_v51 = vmul.f32 %v2620_v61, %v2350_v60  ;;  %4569 = vmatprep.subr.bf16.mxu1 %v6702_v23  ;;  %v6715_v60 = vld [vmem:[#allocation3_spill] sm:$0xff] }
 0x33e   :  { %v2687_v10 = vmul.f32 %v2623_v24, %v2365_v21 }
 0x33f   :  { %v2622_v47 = vadd.f32 0.5, %v2558_v46  ;;  %v4564_v44 = vpack.c.bf16 %v2685_v4, %v2684_v51  ;;  %4369 = vmatmul.mubr.msk.f32.vlgmr.msra.gmra.mrb[50].mxu1 %vm2695_vm4, %v6165_v14  ;;  %v6719_v51 = vld [vmem:[#allocation9_spill] sm:$0xff] }
 0x340   :  { %4571 = vmatpush3.bf16.msra.mxu1 %v6710_v17  ;;  %4394 = vmatprep.mubr.msk.f32.mxu1 %vm4808_vm2, %v6690_v63  ;;  %v6720_v17 = vld [vmem:[#allocation4_spill] sm:$0xff] }
 0x341   :  { %v2686_v15 = vmul.f32 %v2622_v47, %v2360_v38  ;;  %4565 = vmatpush3.bf16.msra.mxu0 %v4564_v44  ;;  %4404 = vmatprep.subr.mxu1 %v6690_v63  ;;  %v4794_v47 = vld [vmem:[%s6624_s6 + $0x5] sm:$0x1] }
 0x342   :  { %4566 = vmatprep.subr.bf16.mxu0 %v6702_v23 }
 0x343   :  { %v4567_v62 = vpack.c.bf16 %v2687_v10, %v2686_v15  ;;  %4395 = vmatmul.mubr.msk.f32.vlgmr.msra.gmra.mrb[52].mxu1 %vm761_vm3, %v3417_v9 }
 0x344   :  { %4406 = vmatprep.mubr.msk.f32.mxu1 %vm4808_vm2, %v6690_v63 }
 0x345   :  { %4568 = vmatpush3.bf16.msra.mxu0 %v4567_v62 }
 0x346   :  { %4572 = vmatprep.subr.bf16.mxu0 %v6702_v23 }
 0x348   :  { %4388 = vmatmul.mubr.msk.f32.vlgmr.msra.gmra.mrb[52].mxu0 %vm2695_vm4, %v6165_v14  ;;  %v4789_v14 = vld [vmem:[%s6624_s6] sm:$0x1] }
 0x349   :  { %4574 = vmatpush3.bf16.msra.mxu0 %v6713_v36  ;;  %4401 = vmatprep.mubr.msk.f32.mxu0 %vm4808_vm2, %v6690_v63 }
 0x34c   :  { %4402 = vmatmul.mubr.msk.f32.vlgmr.msra.gmra.mrb[54].mxu0 %vm761_vm3, %v3528_v11 }
 0x3c2   :  { %v2765_v57 = vpop.f32.mrb[44].mxu1 }
 0x3c3   :  { %v2766_v23 = vadd.f32 %v2765_v57, %v6536_v1  ;;  %v4256_v6 = vpop.f32.mrb[45].mxu1  ;;  %v4795_v57 = vld [vmem:[%s6624_s6 + $0x6] sm:$0x1] }
 0x3c4   :  { %v3607_v6 = vpop.permute.xlu0 %3606 }
 0x3c5   :  { %v3259_v28 = vmul.f32 %v4789_v14, %v2766_v23 }
 0x3c7   :  { %v2835_v40 = vpop.f32.mrb[46].mxu0  ;;  %v3270_v63 = vrot.slane %v3259_v28, %v6714_v26 }
 0x3c8   :  { %v2836_v29 = vadd.f32 %v2835_v40, %v6536_v1  ;;  %v4275_v33 = vpop.f32.mrb[47].mxu0 }
 0x3c9   :  { %v3299_v55 = vmul.f32 %v3270_v63, %v6715_v60  ;;  %v6721_v63 = vld [vmem:[#allocation10_spill] sm:$0xff] }
 0x3ca   :  { %v3260_v59 = vmul.f32 %v4790_v30, %v2836_v29 }
 0x3cb   :  { %v3308_v20 = vsel %vm3307_vm5, %v3299_v55, 0.0 }
 0x3cc   :  { %v3274_v18 = vrot.slane %v3260_v59, %v6714_v26  ;;  %v3446_v59 = vpop.permute.xlu0 %3445 }
 0x3ce   :  { %v3300_v21 = vmul.f32 %v3274_v18, %v6716_v53 }
 0x3d0   :  { %v3309_v42 = vsel %vm3307_vm5, %v3300_v21, 0.0  ;;  %v4796_v21 = vld [vmem:[%s6624_s6 + $0x7] sm:$0x1] }
 0x3d1   :  { %v3310_v58 = vadd.f32 %v3309_v42, %v3308_v20 }
 0x3df   :  { %v2905_v54 = vpop.f32.mrb[46].mxu1 }
 0x3e0   :  { %v2906_v48 = vadd.f32 %v2905_v54, %v6536_v1  ;;  %v4294_v5 = vpop.f32.mrb[47].mxu1  ;;  %v6722_v54 = vld [vmem:[#allocation2_spill] sm:$0xff] }
 0x3e2   :  { %v3261_v38 = vmul.f32 %v4791_v31, %v2906_v48 }
 0x3e4   :  { %v3278_v34 = vrot.slane %v3261_v38, %v6714_v26  ;;  %v2975_v45 = vpop.f32.mrb[48].mxu0  ;;  %v6723_v38 = vld [vmem:[#allocation6_spill] sm:$0xff] }
 0x3e5   :  { %v2976_v16 = vadd.f32 %v2975_v45, %v6536_v1  ;;  %v4313_v49 = vpop.f32.mrb[49].mxu0 }
 0x3e6   :  { %v3301_v43 = vmul.f32 %v3278_v34, %v6717_v0 }
 0x3e7   :  { %v3262_v50 = vmul.f32 %v4792_v32, %v2976_v16 }
 0x3e8   :  { %v3311_v25 = vsel %vm3307_vm5, %v3301_v43, 0.0 }
 0x3e9   :  { %v3312_v56 = vadd.f32 %v3311_v25, %v3310_v58  ;;  %v3282_v19 = vrot.slane %v3262_v50, %v6714_v26 }
 0x3eb   :  { %v3302_v39 = vmul.f32 %v3282_v19, %v6718_v41 }
 0x3ed   :  { %v3313_v3 = vsel %vm3307_vm5, %v3302_v39, 0.0  ;;  %v3615_v39 = vld [vmem:[%s6619_s7 + $0x148] sm:$0x7] }
 0x3ee   :  { %v3314_v8 = vadd.f32 %v3313_v3, %v3312_v56 }
 0x3fb   :  { %v3045_v2 = vpop.f32.mrb[48].mxu1 }
 0x3fc   :  { %v3046_v22 = vadd.f32 %v3045_v2, %v6536_v1  ;;  %v4332_v12 = vpop.f32.mrb[49].mxu1 }
 0x3fe   :  { %v3263_v7 = vmul.f32 %v4793_v13, %v3046_v22  ;;  %v4797_v13 = vld [vmem:[%s6620_s1] sm:$0x7] }
 0x400   :  { %v3286_v4 = vrot.slane %v3263_v7, %v6714_v26  ;;  %v3115_v61 = vpop.f32.mrb[50].mxu0 }
 0x401   :  { %v3116_v24 = vadd.f32 %v3115_v61, %v6536_v1  ;;  %v4351_v46 = vpop.f32.mrb[51].mxu0 }
 0x402   :  { %v3303_v10 = vmul.f32 %v3286_v4, %v6719_v51 }
 0x403   :  { %v3264_v44 = vmul.f32 %v4794_v47, %v3116_v24 }
 0x404   :  { %v3315_v15 = vsel %vm3307_vm5, %v3303_v10, 0.0 }
 0x405   :  { %v3316_v37 = vadd.f32 %v3315_v15, %v3314_v8  ;;  %v3290_v35 = vrot.slane %v3264_v44, %v6714_v26  ;;  %v4798_v44 = vld [vmem:[%s6618_s0] sm:$0x7] }
 0x407   :  { %v3304_v9 = vmul.f32 %v3290_v35, %v6720_v17  ;;  %v3699_v35 = vpop.permute.xlu1 %3698 }
 0x409   :  { %v3317_v62 = vsel %vm3307_vm5, %v3304_v9, 0.0 }
 0x40a   :  { %v3318_v27 = vadd.f32 %v3317_v62, %v3316_v37 }
 0x412   :  { %v3185_v52 = vpop.f32.mrb[50].mxu1 }
 0x413   :  { %v3186_v36 = vadd.f32 %v3185_v52, %v6536_v1  ;;  %v4370_v11 = vpop.f32.mrb[51].mxu1 }
 0x415   :  { %v3265_v23 = vmul.f32 %v4795_v57, %v3186_v36 }
 0x416   :  { %v3517_v14 = vpop.f32.mrb[52].mxu1 }
 0x417   :  { %v3294_v28 = vrot.slane %v3265_v23, %v6714_v26  ;;  %v4396_v40 = vpop.f32.mrb[53].mxu1  ;;  %v3518_v53 = vadd.f32 %v3517_v14, %v3446_v59 }
 0x419   :  { %v3305_v29 = vmul.f32 %v3294_v28, %v6721_v63  ;;  %v3524_v31 = vrot.slane %v3518_v53, %v6714_v26 }
 0x41b   :  { %v3319_v33 = vsel %vm3307_vm5, %v3305_v29, 0.0  ;;  %v3255_v30 = vpop.f32.mrb[52].mxu0 }
 0x41c   :  { %v3320_v60 = vadd.f32 %v3319_v33, %v3318_v27  ;;  %v3256_v55 = vadd.f32 %v3255_v30, %v6536_v1  ;;  %v4389_v18 = vpop.f32.mrb[53].mxu0  ;;  %v31_v1 = vld [vmem:[%s6625_s2] sm:$0x7] }
 0x41d   :  { %v3525_v43 = vmul.f32 %v3524_v31, %v31_v1 }
 0x41e   :  { %v3266_v20 = vmul.f32 %v4796_v21, %v3256_v55 }
 0x41f   :  { %v3598_v42 = vpop.f32.mrb[54].mxu0 }
 0x420   :  { %v3298_v58 = vrot.slane %v3266_v20, %v6714_v26  ;;  %v3602_v48 = vadd.f32 %v3598_v42, %v6722_v54  ;;  %v4403_v5 = vpop.f32.mrb[55].mxu0 }
 0x422   :  { %v3306_v34 = vmul.f32 %v3298_v58, %v6723_v38  ;;  %v3609_v45 = vadd.f32 %v3607_v6, %v3602_v48 }
 0x424   :  { %v3321_v16 = vsel %vm3307_vm5, %v3306_v34, 0.0  ;;  %v3610_v49 = vmul.f32 0.5, %v3609_v45 }
 0x425   :  { %v3322_v0 = vadd.f32 %v3321_v16, %v3320_v60 }
 0x426   :  { %4783 = vtanh.f32 %v3610_v49 }
 0x427   :  { %v3526_v32 = vadd.f32 %v3525_v43, %v3322_v0 }
 0x429   :  { %v3710_v50 = vmul.f32 1.442695, %v3526_v32  ;;  %vm3709_vm8 = vcmp.gt.f32.partialorder %v3526_v32, 0.0  ;;  %v3527_v7 = vadd.f32 %v4797_v13, %v3526_v32 }
 0x42b   :  { %4785 = vpow2.f32 %v3710_v50  ;;  %v3703_v4 = vmul.f32 1.442695, %v3527_v7  ;;  %vm3702_vm10 = vcmp.gt.f32.partialorder %v3527_v7, 0.0 }
 0x42d   :  { %4787 = vpow2.f32 %v3703_v4 }
 0x430   :  { %v4784_v25 = vpop.eup %4783 }
 0x431   :  { %v3612_v56 = vmul.f32 0.5, %v4784_v25 }
 0x433   :  { %v3613_v19 = vadd.f32 0.5, %v3612_v56 }
 0x435   :  { %v4786_v26 = vpop.eup %4785  ;;  %v3614_v41 = vmul.f32 %v3613_v19, %v3609_v45 }
 0x436   :  { %v3838_v3 = vadd.f32 -1.0, %v4786_v26 }
 0x437   :  { %4405 = vmatpush3.msk.msra.mxu1 %vm3620_vm6, %v3614_v41  ;;  %v4788_v61 = vpop.eup %4787 }
 0x438   :  { %v3713_v8 = vmul.f32 1.6732632, %v3838_v3  ;;  %4407 = vmatmul.mubr.msk.f32.vlgmr.msra.gmra.mrb[54].mxu1 %vm3616_vm7, %v3615_v39  ;;  %v3837_v24 = vadd.f32 -1.0, %v4788_v61 }
 0x43a   :  { %v3714_v2 = vsel %vm3709_vm8, %v3526_v32, %v3713_v8  ;;  %v3706_v46 = vmul.f32 1.6732632, %v3837_v24 }
 0x43b   :  { %v3715_v22 = vmul.f32 1.050701, %v3714_v2 }
 0x43c   :  { %v3707_v51 = vsel %vm3702_vm10, %v3527_v7, %v3706_v46 }
 0x43d   :  { %v3720_v12 = vrot.slane %v3715_v22, 2  ;;  %v3708_v10 = vmul.f32 1.050701, %v3707_v51 }
 0x43f   :  { %3726 = vst.msk [vmem:[%s6626_s8 + $0x8] sm:$0x1] %vm3725_vm9, %v3720_v12  ;;  %v3717_v9 = vrot.slane %v3708_v10, 5 }
 0x50b   :  { %v3690_v47 = vpop.f32.mrb[54].mxu1 }
 0x50c   :  { %v3694_v15 = vadd.f32 %v4798_v44, %v3690_v47  ;;  %v4408_v37 = vpop.f32.mrb[55].mxu1 }
 0x50e   :  { %v3701_v17 = vadd.f32 %v3699_v35, %v3694_v15 }
 0x510   :  { %v3722_v62 = vsel %vm85_vm0, %v3701_v17, %v3717_v9 }
 0x511   :  { %v3723_v27 = vsel %vm3620_vm6, %v3722_v62, %v3720_v12 }
 0x512   :  { %3724 = vst.msk [vmem:[%s6626_s8] sm:$0xff] %vm761_vm3, %v3723_v27 }

</bundles_post_ra>
